<compile_context>
chip_gen: v5e
topology: v5e:2x2
jax: 0.10.0
libtpu: 0.0.40
codegen_flags: <defaults>
</compile_context>

<pallas_src>
import functools

import jax
import jax.numpy as jnp
from jax.experimental import pallas as pl
from jax.experimental.pallas import tpu as pltpu

LANE = 128     # TPU lane width (last dim)
SUBLANE = 8    # f32 sublane count (second-to-last dim)


def _round_up(x, m):
    return ((x + m - 1) // m) * m


def _sigmoid_via_tanh(x):
    # sigmoid(x) == 0.5 * tanh(0.5 * x) + 0.5 : one EUP pass instead of exp+recip.
    return 0.5 * jnp.tanh(0.5 * x) + 0.5


def lstm_recurrence_kernel(pre_ref, whh_hbm, out_ref, whh_vmem, h_sc, c_sc, *,
                           seq_len):
    """One (batch block, time chunk) of the LSTM recurrence.

    pre_ref:  (Tc, Bblk, 4*Hp) bf16  precomputed x @ W_ih^T + bias
    whh_hbm:  (Hp, 4*Hp) bf16        W_hh^T, raw HBM ref (memory_space=ANY)
    out_ref:  (Bblk, Hp) f32         final hidden state (written on last chunk)
    whh_vmem: (Hp, 4*Hp) bf16        single-buffered resident copy of W_hh^T
    h_sc,c_sc:(Bblk, Hp) f32         state carried across time chunks in VMEM
    """
    chunk = pl.program_id(1)

    @pl.when(chunk == 0)
    def _():
        # W_hh^T stays in HBM so Pallas does not allocate a double buffer for
        # it; copy it once per batch block into a single VMEM scratch buffer.
        pltpu.sync_copy(whh_hbm, whh_vmem)
        h_sc[...] = jnp.zeros_like(h_sc)
        c_sc[...] = jnp.zeros_like(c_sc)

    tc = pre_ref.shape[0]
    hp = h_sc.shape[1]
    needs_mask = (seq_len % tc) != 0      # Python bool: mask only if remainder
    t0 = chunk * tc                       # global index of this chunk's step 0

    whh = whh_vmem[...]                   # hoist weight load out of the loop
    # TODO(synk): for tiny batch, staging W_hh in the MXU across the chunk via
    # pltpu.matmul_push_rhs / matmul_acc_lhs / matmul_pop would remove weight
    # re-streaming from the serial path (verify in the bundle dump first).

    def step(t, carry):
        h, c = carry
        # bf16 operands, f32 accumulate: one MXU push per time step.
        gates = pre_ref[t].astype(jnp.float32) + jnp.dot(
            h.astype(jnp.bfloat16), whh, preferred_element_type=jnp.float32)
        # Lane-aligned 128-wide gate slices (PyTorch gate order [i, f, g, o]).
        i_g = _sigmoid_via_tanh(gates[:, 0 * hp:1 * hp])
        f_g = _sigmoid_via_tanh(gates[:, 1 * hp:2 * hp])
        g_g = jnp.tanh(gates[:, 2 * hp:3 * hp])
        o_g = _sigmoid_via_tanh(gates[:, 3 * hp:4 * hp])
        c_new = f_g * c + i_g * g_g
        h_new = o_g * jnp.tanh(c_new)
        if needs_mask:
            # Back-padded dummy steps (t0+t >= T) must not advance the state.
            valid = (t0 + t) < seq_len
            h_new = jnp.where(valid, h_new, h)
            c_new = jnp.where(valid, c_new, c)
        return h_new, c_new

    h, c = jax.lax.fori_loop(0, tc, step, (h_sc[...], c_sc[...]), unroll=True)
    h_sc[...] = h
    c_sc[...] = c

    @pl.when(chunk == pl.num_programs(1) - 1)
    def _():
        out_ref[...] = h.astype(out_ref.dtype)


def code_encoder_forward(tokens, emb_table, wih_t, whh_t, bias, *,
                         max_time_chunk=32,
                         vmem_limit_bytes=48 * 1024 * 1024):
    """Forward of CodeEncoder (unidirectional): returns the final hidden state.

    tokens:    (B, T) int32
    emb_table: (V, E) f32 with row 0 zeroed (padding_idx=0)
    wih_t:     (E, 4H) = W_ih^T, gate order [i, f, g, o]
    whh_t:     (H, 4H) = W_hh^T
    bias:      (4H,)   = b_ih + b_hh
    returns:   (B, H) f32   (== h.squeeze(0) in the PyTorch module)
    """
    B, T = tokens.shape
    E = emb_table.shape[1]
    H = whh_t.shape[0]

    Hp = _round_up(H, LANE)       # lane-align hidden: gate slices on 128 boundaries
    Bp = _round_up(B, SUBLANE)    # sublane-align batch

    # Batch block: split into 2 shards when both keep 8-row sublane alignment,
    # so v7x's two TensorCores each take one (parallel axis). Neutral on 1-TC gens.
    Bblk = Bp // 2 if Bp % (2 * SUBLANE) == 0 else Bp

    # Time chunk from an explicit VMEM budget: the bf16 pre-gate double buffer
    # (2 * Tc * Bblk * 4Hp * 2 B) must fit in about half the scoped VMEM limit.
    pre_budget = vmem_limit_bytes // 2
    tc_cap = max(1, pre_budget // (2 * Bblk * 4 * Hp * 2))
    Tc = int(max(1, min(T, max_time_chunk, tc_cap)))
    Tp = _round_up(T, Tc)

    # ---- per-gate zero padding of parameters: H -> Hp --------------------
    wih_p = jnp.pad(wih_t.reshape(E, 4, H),
                    ((0, 0), (0, 0), (0, Hp - H))).reshape(E, 4 * Hp)
    whh_p = jnp.pad(whh_t.reshape(H, 4, H),
                    ((0, Hp - H), (0, 0), (0, Hp - H))).reshape(Hp, 4 * Hp)
    bias_p = jnp.pad(bias.reshape(4, H),
                     ((0, 0), (0, Hp - H))).reshape(1, 4 * Hp)
    whh_b16 = whh_p.astype(jnp.bfloat16)

    # ---- glue: embedding gather + hoisted input projection ----------------
    # Pre-gates are produced DIRECTLY in (T, B, 4Hp) order: transpose/pad the
    # tiny int32 token matrix (cheap), gather, one big MXU matmul, cast to bf16.
    # No transpose or pad pass over the large pre-gate tensor.
    # TODO(synk): if weights are reused across many calls, precompute
    # emb_table @ wih_p + bias_p once and turn this into a pure row gather.
    tok_t = jnp.pad(tokens.T, ((0, Tp - T), (0, Bp - B)))             # (Tp, Bp)
    x = jnp.take(emb_table, tok_t, axis=0).astype(jnp.float32)        # (Tp, Bp, E)
    pre = (x.reshape(Tp * Bp, E) @ wih_p + bias_p).astype(jnp.bfloat16)
    pre = pre.reshape(Tp, Bp, 4 * Hp)                                 # (Tp, Bp, 4Hp)

    kernel = functools.partial(lstm_recurrence_kernel, seq_len=T)

    out = pl.pallas_call(
        kernel,
        out_shape=jax.ShapeDtypeStruct((Bp, Hp), jnp.float32),
        grid_spec=pltpu.PrefetchScalarGridSpec(
            num_scalar_prefetch=0,
            grid=(Bp // Bblk, Tp // Tc),
            in_specs=[
                pl.BlockSpec((Tc, Bblk, 4 * Hp), lambda b, c: (c, b, 0)),
                pl.BlockSpec(memory_space=pl.ANY),   # W_hh^T: raw HBM, manual copy
            ],
            out_specs=pl.BlockSpec((Bblk, Hp), lambda b, c: (b, 0)),
            scratch_shapes=[
                pltpu.VMEM((Hp, 4 * Hp), jnp.bfloat16),  # resident single-buffer W_hh^T
                pltpu.VMEM((Bblk, Hp), jnp.float32),     # h carry
                pltpu.VMEM((Bblk, Hp), jnp.float32),     # c carry
            ],
        ),
        compiler_params=pltpu.CompilerParams(
            dimension_semantics=("parallel", "arbitrary"),  # batch parallel, time serial
            vmem_limit_bytes=vmem_limit_bytes,
        ),
    )(pre, whh_b16)

    return out[:B, :H]


def reference_forward(tokens, emb_table, wih_t, whh_t, bias):
    """Pure-JAX f32 reference (scan over time) for the correctness check."""
    B, T = tokens.shape
    H = whh_t.shape[0]
    x = jnp.take(emb_table, tokens, axis=0).astype(jnp.float32)  # (B, T, E)

    def step(carry, x_t):
        h, c = carry
        gates = x_t @ wih_t + h @ whh_t + bias  # (B, 4H)
        i_g = jax.nn.sigmoid(gates[:, 0 * H:1 * H])
        f_g = jax.nn.sigmoid(gates[:, 1 * H:2 * H])
        g_g = jnp.tanh(gates[:, 2 * H:3 * H])
        o_g = jax.nn.sigmoid(gates[:, 3 * H:4 * H])
        c_new = f_g * c + i_g * g_g
        h_new = o_g * jnp.tanh(c_new)
        return (h_new, c_new), None

    h0 = jnp.zeros((B, H), jnp.float32)
    c0 = jnp.zeros((B, H), jnp.float32)
    (h, _), _ = jax.lax.scan(step, (h0, c0), jnp.transpose(x, (1, 0, 2)))
    return h


if __name__ == "__main__":
    # Small shapes consistent with the module defaults (scaled down).
    VOCAB, EMBED, HIDDEN = 50, 32, 32
    B, T = 2, 8

    key = jax.random.PRNGKey(0)
    k_emb, k_wih, k_whh, k_bih, k_bhh, k_tok = jax.random.split(key, 6)

    # nn.Embedding: N(0,1) init, padding_idx=0 row zeroed.
    emb_table = jax.random.normal(k_emb, (VOCAB, EMBED), jnp.float32)
    emb_table = emb_table.at[0].set(0.0)

    # nn.LSTM params: uniform(-1/sqrt(H), 1/sqrt(H)), gate order [i, f, g, o].
    bound = 1.0 / jnp.sqrt(jnp.float32(HIDDEN))
    w_ih = jax.random.uniform(k_wih, (4 * HIDDEN, EMBED), jnp.float32, -bound, bound)
    w_hh = jax.random.uniform(k_whh, (4 * HIDDEN, HIDDEN), jnp.float32, -bound, bound)
    b_ih = jax.random.uniform(k_bih, (4 * HIDDEN,), jnp.float32, -bound, bound)
    b_hh = jax.random.uniform(k_bhh, (4 * HIDDEN,), jnp.float32, -bound, bound)

    wih_t = w_ih.T                 # (E, 4H)
    whh_t = w_hh.T                 # (H, 4H)
    bias = b_ih + b_hh             # (4H,)

    tokens = jax.random.randint(k_tok, (B, T), 0, VOCAB, dtype=jnp.int32)

    ref = reference_forward(tokens, emb_table, wih_t, whh_t, bias)

    # Full-chunk path (Tc divides T).
    out = code_encoder_forward(tokens, emb_table, wih_t, whh_t, bias)
    out = jax.block_until_ready(out)
    assert out.shape == (B, HIDDEN)
    err = float(jnp.max(jnp.abs(out - ref)))
    # bf16 pre-gates/W_hh vs f32 scan reference -> loosened tolerance.
    assert err < 5e-2, f"max abs err = {err}"

    # Remainder path: Tc=3 does not divide T=8 -> exercises the in-kernel mask.
    out2 = code_encoder_forward(tokens, emb_table, wih_t, whh_t, bias,
                                max_time_chunk=3)
    out2 = jax.block_until_ready(out2)
    err2 = float(jnp.max(jnp.abs(out2 - ref)))
    assert err2 < 5e-2, f"max abs err (remainder path) = {err2}"

    print("KERNEL_OK")
</pallas_src>

<mosaic_0001>
module attributes {stable_mosaic.version = 11 : i64} {
  func.func @lstm_recurrence_kernel(%arg0: i32, %arg1: i32, %arg2: memref<8x8x512xbf16, #tpu.memory_space<vmem>>, %arg3: memref<128x512xbf16, #tpu.memory_space<any>>, %arg4: memref<8x128xf32, #tpu.memory_space<vmem>>, %arg5: memref<128x512xbf16, #tpu.memory_space<vmem>>, %arg6: memref<8x128xf32, #tpu.memory_space<vmem>>, %arg7: memref<8x128xf32, #tpu.memory_space<vmem>>) attributes {dimension_semantics = [#tpu.dimension_semantics<parallel>, #tpu.dimension_semantics<arbitrary>], iteration_bounds = array<i64: 1, 1>, scalar_prefetch = 0 : i64, scratch_operands = 3 : i64, tpu.core_type = #tpu.core_type<tc>, window_params = [{transform_indices = @transform_0, window_bounds = array<i64: 8, 8, 512>}, {}, {transform_indices = @transform_2, window_bounds = array<i64: 8, 128>}]} {
    %c0_i32 = arith.constant 0 : i32
    %0 = arith.cmpi eq, %arg1, %c0_i32 : i32
    %1 = arith.extui %0 : i1 to i32
    %c0_i32_0 = arith.constant 0 : i32
    %2 = arith.cmpi ne, %1, %c0_i32_0 : i32
    scf.if %2 {
      "tpu.region"() ({
        %319 = tpu.sem_alloc : memref<!tpu.dma_semaphore, #tpu.memory_space<semaphore_mem>>
        tpu.enqueue_dma source(%arg3 : memref<128x512xbf16, #tpu.memory_space<any>>) target(%arg5 : memref<128x512xbf16, #tpu.memory_space<vmem>>) target_semaphore(%319 : memref<!tpu.dma_semaphore, #tpu.memory_space<semaphore_mem>>)
        tpu.wait_dma2 semaphore(%319 : memref<!tpu.dma_semaphore, #tpu.memory_space<semaphore_mem>>) src(%arg3 : memref<128x512xbf16, #tpu.memory_space<any>>) dst(%arg5 : memref<128x512xbf16, #tpu.memory_space<vmem>>)
        tpu.yield
      }) : () -> ()
      %cst_108 = arith.constant 0.000000e+00 : f32
      %315 = vector.broadcast %cst_108 : f32 to vector<8x128xf32>
      %c0_109 = arith.constant 0 : index
      %c0_110 = arith.constant 0 : index
      %316 = vector.load %arg6[%c0_109, %c0_110] : memref<8x128xf32, #tpu.memory_space<vmem>>, vector<8x128xf32>
      tpu.vector_store %arg6[%c0_109, %c0_110], %315 {strides = array<i32>} : memref<8x128xf32, #tpu.memory_space<vmem>>, vector<8x128xf32>,
      %cst_111 = arith.constant 0.000000e+00 : f32
      %317 = vector.broadcast %cst_111 : f32 to vector<8x128xf32>
      %c0_112 = arith.constant 0 : index
      %c0_113 = arith.constant 0 : index
      %318 = vector.load %arg7[%c0_112, %c0_113] : memref<8x128xf32, #tpu.memory_space<vmem>>, vector<8x128xf32>
      tpu.vector_store %arg7[%c0_112, %c0_113], %317 {strides = array<i32>} : memref<8x128xf32, #tpu.memory_space<vmem>>, vector<8x128xf32>,
    } else {
    }
    %c0 = arith.constant 0 : index
    %c0_1 = arith.constant 0 : index
    %3 = vector.load %arg5[%c0, %c0_1] : memref<128x512xbf16, #tpu.memory_space<vmem>>, vector<128x512xbf16>
    %c0_2 = arith.constant 0 : index
    %c0_3 = arith.constant 0 : index
    %4 = vector.load %arg6[%c0_2, %c0_3] : memref<8x128xf32, #tpu.memory_space<vmem>>, vector<8x128xf32>
    %c0_4 = arith.constant 0 : index
    %c0_5 = arith.constant 0 : index
    %5 = vector.load %arg7[%c0_4, %c0_5] : memref<8x128xf32, #tpu.memory_space<vmem>>, vector<8x128xf32>
    %c0_i32_6 = arith.constant 0 : i32
    %6 = arith.index_cast %c0_i32_6 : i32 to index
    %c0_7 = arith.constant 0 : index
    %c0_8 = arith.constant 0 : index
    %7 = vector.load %arg2[%6, %c0_7, %c0_8] : memref<8x8x512xbf16, #tpu.memory_space<vmem>>, vector<1x8x512xbf16>
    %8 = vector.shape_cast %7 : vector<1x8x512xbf16> to vector<8x512xbf16>
    %9 = arith.extf %8 : vector<8x512xbf16> to vector<8x512xf32>
    %10 = arith.truncf %4 : vector<8x128xf32> to vector<8x128xbf16>
    %cst = arith.constant dense<0.000000e+00> : vector<8x512xf32>
    %11 = tpu.matmul %10, %3, %cst {dimension_numbers = #tpu.dot_dimension_numbers<[1], [0], [0], [1], [0, 0, 1, 1], [], []>} : vector<8x128xbf16>, vector<128x512xbf16>, vector<8x512xf32> -> vector<8x512xf32>
    %12 = arith.addf %9, %11 : vector<8x512xf32>
    %13 = vector.extract_strided_slice %12 {offsets = [0, 0], sizes = [8, 128], strides = [1, 1]} : vector<8x512xf32> to vector<8x128xf32>
    %cst_9 = arith.constant 5.000000e-01 : f32
    %14 = vector.broadcast %cst_9 : f32 to vector<8x128xf32>
    %15 = arith.mulf %14, %13 : vector<8x128xf32>
    %16 = math.tanh %15 : vector<8x128xf32>
    %cst_10 = arith.constant 5.000000e-01 : f32
    %17 = vector.broadcast %cst_10 : f32 to vector<8x128xf32>
    %18 = arith.mulf %17, %16 : vector<8x128xf32>
    %cst_11 = arith.constant 5.000000e-01 : f32
    %19 = vector.broadcast %cst_11 : f32 to vector<8x128xf32>
    %20 = arith.addf %18, %19 : vector<8x128xf32>
    %21 = vector.extract_strided_slice %12 {offsets = [0, 128], sizes = [8, 128], strides = [1, 1]} : vector<8x512xf32> to vector<8x128xf32>
    %cst_12 = arith.constant 5.000000e-01 : f32
    %22 = vector.broadcast %cst_12 : f32 to vector<8x128xf32>
    %23 = arith.mulf %22, %21 : vector<8x128xf32>
    %24 = math.tanh %23 : vector<8x128xf32>
    %cst_13 = arith.constant 5.000000e-01 : f32
    %25 = vector.broadcast %cst_13 : f32 to vector<8x128xf32>
    %26 = arith.mulf %25, %24 : vector<8x128xf32>
    %cst_14 = arith.constant 5.000000e-01 : f32
    %27 = vector.broadcast %cst_14 : f32 to vector<8x128xf32>
    %28 = arith.addf %26, %27 : vector<8x128xf32>
    %29 = vector.extract_strided_slice %12 {offsets = [0, 256], sizes = [8, 128], strides = [1, 1]} : vector<8x512xf32> to vector<8x128xf32>
    %30 = math.tanh %29 : vector<8x128xf32>
    %31 = vector.extract_strided_slice %12 {offsets = [0, 384], sizes = [8, 128], strides = [1, 1]} : vector<8x512xf32> to vector<8x128xf32>
    %cst_15 = arith.constant 5.000000e-01 : f32
    %32 = vector.broadcast %cst_15 : f32 to vector<8x128xf32>
    %33 = arith.mulf %32, %31 : vector<8x128xf32>
    %34 = math.tanh %33 : vector<8x128xf32>
    %cst_16 = arith.constant 5.000000e-01 : f32
    %35 = vector.broadcast %cst_16 : f32 to vector<8x128xf32>
    %36 = arith.mulf %35, %34 : vector<8x128xf32>
    %cst_17 = arith.constant 5.000000e-01 : f32
    %37 = vector.broadcast %cst_17 : f32 to vector<8x128xf32>
    %38 = arith.addf %36, %37 : vector<8x128xf32>
    %39 = arith.mulf %28, %5 : vector<8x128xf32>
    %40 = arith.mulf %20, %30 : vector<8x128xf32>
    %41 = arith.addf %39, %40 : vector<8x128xf32>
    %42 = math.tanh %41 : vector<8x128xf32>
    %43 = arith.mulf %38, %42 : vector<8x128xf32>
    %c1_i32 = arith.constant 1 : i32
    %44 = arith.index_cast %c1_i32 : i32 to index
    %c0_18 = arith.constant 0 : index
    %c0_19 = arith.constant 0 : index
    %45 = vector.load %arg2[%44, %c0_18, %c0_19] : memref<8x8x512xbf16, #tpu.memory_space<vmem>>, vector<1x8x512xbf16>
    %46 = vector.shape_cast %45 : vector<1x8x512xbf16> to vector<8x512xbf16>
    %47 = arith.extf %46 : vector<8x512xbf16> to vector<8x512xf32>
    %48 = arith.truncf %43 : vector<8x128xf32> to vector<8x128xbf16>
    %cst_20 = arith.constant dense<0.000000e+00> : vector<8x512xf32>
    %49 = tpu.matmul %48, %3, %cst_20 {dimension_numbers = #tpu.dot_dimension_numbers<[1], [0], [0], [1], [0, 0, 1, 1], [], []>} : vector<8x128xbf16>, vector<128x512xbf16>, vector<8x512xf32> -> vector<8x512xf32>
    %50 = arith.addf %47, %49 : vector<8x512xf32>
    %51 = vector.extract_strided_slice %50 {offsets = [0, 0], sizes = [8, 128], strides = [1, 1]} : vector<8x512xf32> to vector<8x128xf32>
    %cst_21 = arith.constant 5.000000e-01 : f32
    %52 = vector.broadcast %cst_21 : f32 to vector<8x128xf32>
    %53 = arith.mulf %52, %51 : vector<8x128xf32>
    %54 = math.tanh %53 : vector<8x128xf32>
    %cst_22 = arith.constant 5.000000e-01 : f32
    %55 = vector.broadcast %cst_22 : f32 to vector<8x128xf32>
    %56 = arith.mulf %55, %54 : vector<8x128xf32>
    %cst_23 = arith.constant 5.000000e-01 : f32
    %57 = vector.broadcast %cst_23 : f32 to vector<8x128xf32>
    %58 = arith.addf %56, %57 : vector<8x128xf32>
    %59 = vector.extract_strided_slice %50 {offsets = [0, 128], sizes = [8, 128], strides = [1, 1]} : vector<8x512xf32> to vector<8x128xf32>
    %cst_24 = arith.constant 5.000000e-01 : f32
    %60 = vector.broadcast %cst_24 : f32 to vector<8x128xf32>
    %61 = arith.mulf %60, %59 : vector<8x128xf32>
    %62 = math.tanh %61 : vector<8x128xf32>
    %cst_25 = arith.constant 5.000000e-01 : f32
    %63 = vector.broadcast %cst_25 : f32 to vector<8x128xf32>
    %64 = arith.mulf %63, %62 : vector<8x128xf32>
    %cst_26 = arith.constant 5.000000e-01 : f32
    %65 = vector.broadcast %cst_26 : f32 to vector<8x128xf32>
    %66 = arith.addf %64, %65 : vector<8x128xf32>
    %67 = vector.extract_strided_slice %50 {offsets = [0, 256], sizes = [8, 128], strides = [1, 1]} : vector<8x512xf32> to vector<8x128xf32>
    %68 = math.tanh %67 : vector<8x128xf32>
    %69 = vector.extract_strided_slice %50 {offsets = [0, 384], sizes = [8, 128], strides = [1, 1]} : vector<8x512xf32> to vector<8x128xf32>
    %cst_27 = arith.constant 5.000000e-01 : f32
    %70 = vector.broadcast %cst_27 : f32 to vector<8x128xf32>
    %71 = arith.mulf %70, %69 : vector<8x128xf32>
    %72 = math.tanh %71 : vector<8x128xf32>
    %cst_28 = arith.constant 5.000000e-01 : f32
    %73 = vector.broadcast %cst_28 : f32 to vector<8x128xf32>
    %74 = arith.mulf %73, %72 : vector<8x128xf32>
    %cst_29 = arith.constant 5.000000e-01 : f32
    %75 = vector.broadcast %cst_29 : f32 to vector<8x128xf32>
    %76 = arith.addf %74, %75 : vector<8x128xf32>
    %77 = arith.mulf %66, %41 : vector<8x128xf32>
    %78 = arith.mulf %58, %68 : vector<8x128xf32>
    %79 = arith.addf %77, %78 : vector<8x128xf32>
    %80 = math.tanh %79 : vector<8x128xf32>
    %81 = arith.mulf %76, %80 : vector<8x128xf32>
    %c2_i32 = arith.constant 2 : i32
    %82 = arith.index_cast %c2_i32 : i32 to index
    %c0_30 = arith.constant 0 : index
    %c0_31 = arith.constant 0 : index
    %83 = vector.load %arg2[%82, %c0_30, %c0_31] : memref<8x8x512xbf16, #tpu.memory_space<vmem>>, vector<1x8x512xbf16>
    %84 = vector.shape_cast %83 : vector<1x8x512xbf16> to vector<8x512xbf16>
    %85 = arith.extf %84 : vector<8x512xbf16> to vector<8x512xf32>
    %86 = arith.truncf %81 : vector<8x128xf32> to vector<8x128xbf16>
    %cst_32 = arith.constant dense<0.000000e+00> : vector<8x512xf32>
    %87 = tpu.matmul %86, %3, %cst_32 {dimension_numbers = #tpu.dot_dimension_numbers<[1], [0], [0], [1], [0, 0, 1, 1], [], []>} : vector<8x128xbf16>, vector<128x512xbf16>, vector<8x512xf32> -> vector<8x512xf32>
    %88 = arith.addf %85, %87 : vector<8x512xf32>
    %89 = vector.extract_strided_slice %88 {offsets = [0, 0], sizes = [8, 128], strides = [1, 1]} : vector<8x512xf32> to vector<8x128xf32>
    %cst_33 = arith.constant 5.000000e-01 : f32
    %90 = vector.broadcast %cst_33 : f32 to vector<8x128xf32>
    %91 = arith.mulf %90, %89 : vector<8x128xf32>
    %92 = math.tanh %91 : vector<8x128xf32>
    %cst_34 = arith.constant 5.000000e-01 : f32
    %93 = vector.broadcast %cst_34 : f32 to vector<8x128xf32>
    %94 = arith.mulf %93, %92 : vector<8x128xf32>
    %cst_35 = arith.constant 5.000000e-01 : f32
    %95 = vector.broadcast %cst_35 : f32 to vector<8x128xf32>
    %96 = arith.addf %94, %95 : vector<8x128xf32>
    %97 = vector.extract_strided_slice %88 {offsets = [0, 128], sizes = [8, 128], strides = [1, 1]} : vector<8x512xf32> to vector<8x128xf32>
    %cst_36 = arith.constant 5.000000e-01 : f32
    %98 = vector.broadcast %cst_36 : f32 to vector<8x128xf32>
    %99 = arith.mulf %98, %97 : vector<8x128xf32>
    %100 = math.tanh %99 : vector<8x128xf32>
    %cst_37 = arith.constant 5.000000e-01 : f32
    %101 = vector.broadcast %cst_37 : f32 to vector<8x128xf32>
    %102 = arith.mulf %101, %100 : vector<8x128xf32>
    %cst_38 = arith.constant 5.000000e-01 : f32
    %103 = vector.broadcast %cst_38 : f32 to vector<8x128xf32>
    %104 = arith.addf %102, %103 : vector<8x128xf32>
    %105 = vector.extract_strided_slice %88 {offsets = [0, 256], sizes = [8, 128], strides = [1, 1]} : vector<8x512xf32> to vector<8x128xf32>
    %106 = math.tanh %105 : vector<8x128xf32>
    %107 = vector.extract_strided_slice %88 {offsets = [0, 384], sizes = [8, 128], strides = [1, 1]} : vector<8x512xf32> to vector<8x128xf32>
    %cst_39 = arith.constant 5.000000e-01 : f32
    %108 = vector.broadcast %cst_39 : f32 to vector<8x128xf32>
    %109 = arith.mulf %108, %107 : vector<8x128xf32>
    %110 = math.tanh %109 : vector<8x128xf32>
    %cst_40 = arith.constant 5.000000e-01 : f32
    %111 = vector.broadcast %cst_40 : f32 to vector<8x128xf32>
    %112 = arith.mulf %111, %110 : vector<8x128xf32>
    %cst_41 = arith.constant 5.000000e-01 : f32
    %113 = vector.broadcast %cst_41 : f32 to vector<8x128xf32>
    %114 = arith.addf %112, %113 : vector<8x128xf32>
    %115 = arith.mulf %104, %79 : vector<8x128xf32>
    %116 = arith.mulf %96, %106 : vector<8x128xf32>
    %117 = arith.addf %115, %116 : vector<8x128xf32>
    %118 = math.tanh %117 : vector<8x128xf32>
    %119 = arith.mulf %114, %118 : vector<8x128xf32>
    %c3_i32 = arith.constant 3 : i32
    %120 = arith.index_cast %c3_i32 : i32 to index
    %c0_42 = arith.constant 0 : index
    %c0_43 = arith.constant 0 : index
    %121 = vector.load %arg2[%120, %c0_42, %c0_43] : memref<8x8x512xbf16, #tpu.memory_space<vmem>>, vector<1x8x512xbf16>
    %122 = vector.shape_cast %121 : vector<1x8x512xbf16> to vector<8x512xbf16>
    %123 = arith.extf %122 : vector<8x512xbf16> to vector<8x512xf32>
    %124 = arith.truncf %119 : vector<8x128xf32> to vector<8x128xbf16>
    %cst_44 = arith.constant dense<0.000000e+00> : vector<8x512xf32>
    %125 = tpu.matmul %124, %3, %cst_44 {dimension_numbers = #tpu.dot_dimension_numbers<[1], [0], [0], [1], [0, 0, 1, 1], [], []>} : vector<8x128xbf16>, vector<128x512xbf16>, vector<8x512xf32> -> vector<8x512xf32>
    %126 = arith.addf %123, %125 : vector<8x512xf32>
    %127 = vector.extract_strided_slice %126 {offsets = [0, 0], sizes = [8, 128], strides = [1, 1]} : vector<8x512xf32> to vector<8x128xf32>
    %cst_45 = arith.constant 5.000000e-01 : f32
    %128 = vector.broadcast %cst_45 : f32 to vector<8x128xf32>
    %129 = arith.mulf %128, %127 : vector<8x128xf32>
    %130 = math.tanh %129 : vector<8x128xf32>
    %cst_46 = arith.constant 5.000000e-01 : f32
    %131 = vector.broadcast %cst_46 : f32 to vector<8x128xf32>
    %132 = arith.mulf %131, %130 : vector<8x128xf32>
    %cst_47 = arith.constant 5.000000e-01 : f32
    %133 = vector.broadcast %cst_47 : f32 to vector<8x128xf32>
    %134 = arith.addf %132, %133 : vector<8x128xf32>
    %135 = vector.extract_strided_slice %126 {offsets = [0, 128], sizes = [8, 128], strides = [1, 1]} : vector<8x512xf32> to vector<8x128xf32>
    %cst_48 = arith.constant 5.000000e-01 : f32
    %136 = vector.broadcast %cst_48 : f32 to vector<8x128xf32>
    %137 = arith.mulf %136, %135 : vector<8x128xf32>
    %138 = math.tanh %137 : vector<8x128xf32>
    %cst_49 = arith.constant 5.000000e-01 : f32
    %139 = vector.broadcast %cst_49 : f32 to vector<8x128xf32>
    %140 = arith.mulf %139, %138 : vector<8x128xf32>
    %cst_50 = arith.constant 5.000000e-01 : f32
    %141 = vector.broadcast %cst_50 : f32 to vector<8x128xf32>
    %142 = arith.addf %140, %141 : vector<8x128xf32>
    %143 = vector.extract_strided_slice %126 {offsets = [0, 256], sizes = [8, 128], strides = [1, 1]} : vector<8x512xf32> to vector<8x128xf32>
    %144 = math.tanh %143 : vector<8x128xf32>
    %145 = vector.extract_strided_slice %126 {offsets = [0, 384], sizes = [8, 128], strides = [1, 1]} : vector<8x512xf32> to vector<8x128xf32>
    %cst_51 = arith.constant 5.000000e-01 : f32
    %146 = vector.broadcast %cst_51 : f32 to vector<8x128xf32>
    %147 = arith.mulf %146, %145 : vector<8x128xf32>
    %148 = math.tanh %147 : vector<8x128xf32>
    %cst_52 = arith.constant 5.000000e-01 : f32
    %149 = vector.broadcast %cst_52 : f32 to vector<8x128xf32>
    %150 = arith.mulf %149, %148 : vector<8x128xf32>
    %cst_53 = arith.constant 5.000000e-01 : f32
    %151 = vector.broadcast %cst_53 : f32 to vector<8x128xf32>
    %152 = arith.addf %150, %151 : vector<8x128xf32>
    %153 = arith.mulf %142, %117 : vector<8x128xf32>
    %154 = arith.mulf %134, %144 : vector<8x128xf32>
    %155 = arith.addf %153, %154 : vector<8x128xf32>
    %156 = math.tanh %155 : vector<8x128xf32>
    %157 = arith.mulf %152, %156 : vector<8x128xf32>
    %c4_i32 = arith.constant 4 : i32
    %158 = arith.index_cast %c4_i32 : i32 to index
    %c0_54 = arith.constant 0 : index
    %c0_55 = arith.constant 0 : index
    %159 = vector.load %arg2[%158, %c0_54, %c0_55] : memref<8x8x512xbf16, #tpu.memory_space<vmem>>, vector<1x8x512xbf16>
    %160 = vector.shape_cast %159 : vector<1x8x512xbf16> to vector<8x512xbf16>
    %161 = arith.extf %160 : vector<8x512xbf16> to vector<8x512xf32>
    %162 = arith.truncf %157 : vector<8x128xf32> to vector<8x128xbf16>
    %cst_56 = arith.constant dense<0.000000e+00> : vector<8x512xf32>
    %163 = tpu.matmul %162, %3, %cst_56 {dimension_numbers = #tpu.dot_dimension_numbers<[1], [0], [0], [1], [0, 0, 1, 1], [], []>} : vector<8x128xbf16>, vector<128x512xbf16>, vector<8x512xf32> -> vector<8x512xf32>
    %164 = arith.addf %161, %163 : vector<8x512xf32>
    %165 = vector.extract_strided_slice %164 {offsets = [0, 0], sizes = [8, 128], strides = [1, 1]} : vector<8x512xf32> to vector<8x128xf32>
    %cst_57 = arith.constant 5.000000e-01 : f32
    %166 = vector.broadcast %cst_57 : f32 to vector<8x128xf32>
    %167 = arith.mulf %166, %165 : vector<8x128xf32>
    %168 = math.tanh %167 : vector<8x128xf32>
    %cst_58 = arith.constant 5.000000e-01 : f32
    %169 = vector.broadcast %cst_58 : f32 to vector<8x128xf32>
    %170 = arith.mulf %169, %168 : vector<8x128xf32>
    %cst_59 = arith.constant 5.000000e-01 : f32
    %171 = vector.broadcast %cst_59 : f32 to vector<8x128xf32>
    %172 = arith.addf %170, %171 : vector<8x128xf32>
    %173 = vector.extract_strided_slice %164 {offsets = [0, 128], sizes = [8, 128], strides = [1, 1]} : vector<8x512xf32> to vector<8x128xf32>
    %cst_60 = arith.constant 5.000000e-01 : f32
    %174 = vector.broadcast %cst_60 : f32 to vector<8x128xf32>
    %175 = arith.mulf %174, %173 : vector<8x128xf32>
    %176 = math.tanh %175 : vector<8x128xf32>
    %cst_61 = arith.constant 5.000000e-01 : f32
    %177 = vector.broadcast %cst_61 : f32 to vector<8x128xf32>
    %178 = arith.mulf %177, %176 : vector<8x128xf32>
    %cst_62 = arith.constant 5.000000e-01 : f32
    %179 = vector.broadcast %cst_62 : f32 to vector<8x128xf32>
    %180 = arith.addf %178, %179 : vector<8x128xf32>
    %181 = vector.extract_strided_slice %164 {offsets = [0, 256], sizes = [8, 128], strides = [1, 1]} : vector<8x512xf32> to vector<8x128xf32>
    %182 = math.tanh %181 : vector<8x128xf32>
    %183 = vector.extract_strided_slice %164 {offsets = [0, 384], sizes = [8, 128], strides = [1, 1]} : vector<8x512xf32> to vector<8x128xf32>
    %cst_63 = arith.constant 5.000000e-01 : f32
    %184 = vector.broadcast %cst_63 : f32 to vector<8x128xf32>
    %185 = arith.mulf %184, %183 : vector<8x128xf32>
    %186 = math.tanh %185 : vector<8x128xf32>
    %cst_64 = arith.constant 5.000000e-01 : f32
    %187 = vector.broadcast %cst_64 : f32 to vector<8x128xf32>
    %188 = arith.mulf %187, %186 : vector<8x128xf32>
    %cst_65 = arith.constant 5.000000e-01 : f32
    %189 = vector.broadcast %cst_65 : f32 to vector<8x128xf32>
    %190 = arith.addf %188, %189 : vector<8x128xf32>
    %191 = arith.mulf %180, %155 : vector<8x128xf32>
    %192 = arith.mulf %172, %182 : vector<8x128xf32>
    %193 = arith.addf %191, %192 : vector<8x128xf32>
    %194 = math.tanh %193 : vector<8x128xf32>
    %195 = arith.mulf %190, %194 : vector<8x128xf32>
    %c5_i32 = arith.constant 5 : i32
    %196 = arith.index_cast %c5_i32 : i32 to index
    %c0_66 = arith.constant 0 : index
    %c0_67 = arith.constant 0 : index
    %197 = vector.load %arg2[%196, %c0_66, %c0_67] : memref<8x8x512xbf16, #tpu.memory_space<vmem>>, vector<1x8x512xbf16>
    %198 = vector.shape_cast %197 : vector<1x8x512xbf16> to vector<8x512xbf16>
    %199 = arith.extf %198 : vector<8x512xbf16> to vector<8x512xf32>
    %200 = arith.truncf %195 : vector<8x128xf32> to vector<8x128xbf16>
    %cst_68 = arith.constant dense<0.000000e+00> : vector<8x512xf32>
    %201 = tpu.matmul %200, %3, %cst_68 {dimension_numbers = #tpu.dot_dimension_numbers<[1], [0], [0], [1], [0, 0, 1, 1], [], []>} : vector<8x128xbf16>, vector<128x512xbf16>, vector<8x512xf32> -> vector<8x512xf32>
    %202 = arith.addf %199, %201 : vector<8x512xf32>
    %203 = vector.extract_strided_slice %202 {offsets = [0, 0], sizes = [8, 128], strides = [1, 1]} : vector<8x512xf32> to vector<8x128xf32>
    %cst_69 = arith.constant 5.000000e-01 : f32
    %204 = vector.broadcast %cst_69 : f32 to vector<8x128xf32>
    %205 = arith.mulf %204, %203 : vector<8x128xf32>
    %206 = math.tanh %205 : vector<8x128xf32>
    %cst_70 = arith.constant 5.000000e-01 : f32
    %207 = vector.broadcast %cst_70 : f32 to vector<8x128xf32>
    %208 = arith.mulf %207, %206 : vector<8x128xf32>
    %cst_71 = arith.constant 5.000000e-01 : f32
    %209 = vector.broadcast %cst_71 : f32 to vector<8x128xf32>
    %210 = arith.addf %208, %209 : vector<8x128xf32>
    %211 = vector.extract_strided_slice %202 {offsets = [0, 128], sizes = [8, 128], strides = [1, 1]} : vector<8x512xf32> to vector<8x128xf32>
    %cst_72 = arith.constant 5.000000e-01 : f32
    %212 = vector.broadcast %cst_72 : f32 to vector<8x128xf32>
    %213 = arith.mulf %212, %211 : vector<8x128xf32>
    %214 = math.tanh %213 : vector<8x128xf32>
    %cst_73 = arith.constant 5.000000e-01 : f32
    %215 = vector.broadcast %cst_73 : f32 to vector<8x128xf32>
    %216 = arith.mulf %215, %214 : vector<8x128xf32>
    %cst_74 = arith.constant 5.000000e-01 : f32
    %217 = vector.broadcast %cst_74 : f32 to vector<8x128xf32>
    %218 = arith.addf %216, %217 : vector<8x128xf32>
    %219 = vector.extract_strided_slice %202 {offsets = [0, 256], sizes = [8, 128], strides = [1, 1]} : vector<8x512xf32> to vector<8x128xf32>
    %220 = math.tanh %219 : vector<8x128xf32>
    %221 = vector.extract_strided_slice %202 {offsets = [0, 384], sizes = [8, 128], strides = [1, 1]} : vector<8x512xf32> to vector<8x128xf32>
    %cst_75 = arith.constant 5.000000e-01 : f32
    %222 = vector.broadcast %cst_75 : f32 to vector<8x128xf32>
    %223 = arith.mulf %222, %221 : vector<8x128xf32>
    %224 = math.tanh %223 : vector<8x128xf32>
    %cst_76 = arith.constant 5.000000e-01 : f32
    %225 = vector.broadcast %cst_76 : f32 to vector<8x128xf32>
    %226 = arith.mulf %225, %224 : vector<8x128xf32>
    %cst_77 = arith.constant 5.000000e-01 : f32
    %227 = vector.broadcast %cst_77 : f32 to vector<8x128xf32>
    %228 = arith.addf %226, %227 : vector<8x128xf32>
    %229 = arith.mulf %218, %193 : vector<8x128xf32>
    %230 = arith.mulf %210, %220 : vector<8x128xf32>
    %231 = arith.addf %229, %230 : vector<8x128xf32>
    %232 = math.tanh %231 : vector<8x128xf32>
    %233 = arith.mulf %228, %232 : vector<8x128xf32>
    %c6_i32 = arith.constant 6 : i32
    %234 = arith.index_cast %c6_i32 : i32 to index
    %c0_78 = arith.constant 0 : index
    %c0_79 = arith.constant 0 : index
    %235 = vector.load %arg2[%234, %c0_78, %c0_79] : memref<8x8x512xbf16, #tpu.memory_space<vmem>>, vector<1x8x512xbf16>
    %236 = vector.shape_cast %235 : vector<1x8x512xbf16> to vector<8x512xbf16>
    %237 = arith.extf %236 : vector<8x512xbf16> to vector<8x512xf32>
    %238 = arith.truncf %233 : vector<8x128xf32> to vector<8x128xbf16>
    %cst_80 = arith.constant dense<0.000000e+00> : vector<8x512xf32>
    %239 = tpu.matmul %238, %3, %cst_80 {dimension_numbers = #tpu.dot_dimension_numbers<[1], [0], [0], [1], [0, 0, 1, 1], [], []>} : vector<8x128xbf16>, vector<128x512xbf16>, vector<8x512xf32> -> vector<8x512xf32>
    %240 = arith.addf %237, %239 : vector<8x512xf32>
    %241 = vector.extract_strided_slice %240 {offsets = [0, 0], sizes = [8, 128], strides = [1, 1]} : vector<8x512xf32> to vector<8x128xf32>
    %cst_81 = arith.constant 5.000000e-01 : f32
    %242 = vector.broadcast %cst_81 : f32 to vector<8x128xf32>
    %243 = arith.mulf %242, %241 : vector<8x128xf32>
    %244 = math.tanh %243 : vector<8x128xf32>
    %cst_82 = arith.constant 5.000000e-01 : f32
    %245 = vector.broadcast %cst_82 : f32 to vector<8x128xf32>
    %246 = arith.mulf %245, %244 : vector<8x128xf32>
    %cst_83 = arith.constant 5.000000e-01 : f32
    %247 = vector.broadcast %cst_83 : f32 to vector<8x128xf32>
    %248 = arith.addf %246, %247 : vector<8x128xf32>
    %249 = vector.extract_strided_slice %240 {offsets = [0, 128], sizes = [8, 128], strides = [1, 1]} : vector<8x512xf32> to vector<8x128xf32>
    %cst_84 = arith.constant 5.000000e-01 : f32
    %250 = vector.broadcast %cst_84 : f32 to vector<8x128xf32>
    %251 = arith.mulf %250, %249 : vector<8x128xf32>
    %252 = math.tanh %251 : vector<8x128xf32>
    %cst_85 = arith.constant 5.000000e-01 : f32
    %253 = vector.broadcast %cst_85 : f32 to vector<8x128xf32>
    %254 = arith.mulf %253, %252 : vector<8x128xf32>
    %cst_86 = arith.constant 5.000000e-01 : f32
    %255 = vector.broadcast %cst_86 : f32 to vector<8x128xf32>
    %256 = arith.addf %254, %255 : vector<8x128xf32>
    %257 = vector.extract_strided_slice %240 {offsets = [0, 256], sizes = [8, 128], strides = [1, 1]} : vector<8x512xf32> to vector<8x128xf32>
    %258 = math.tanh %257 : vector<8x128xf32>
    %259 = vector.extract_strided_slice %240 {offsets = [0, 384], sizes = [8, 128], strides = [1, 1]} : vector<8x512xf32> to vector<8x128xf32>
    %cst_87 = arith.constant 5.000000e-01 : f32
    %260 = vector.broadcast %cst_87 : f32 to vector<8x128xf32>
    %261 = arith.mulf %260, %259 : vector<8x128xf32>
    %262 = math.tanh %261 : vector<8x128xf32>
    %cst_88 = arith.constant 5.000000e-01 : f32
    %263 = vector.broadcast %cst_88 : f32 to vector<8x128xf32>
    %264 = arith.mulf %263, %262 : vector<8x128xf32>
    %cst_89 = arith.constant 5.000000e-01 : f32
    %265 = vector.broadcast %cst_89 : f32 to vector<8x128xf32>
    %266 = arith.addf %264, %265 : vector<8x128xf32>
    %267 = arith.mulf %256, %231 : vector<8x128xf32>
    %268 = arith.mulf %248, %258 : vector<8x128xf32>
    %269 = arith.addf %267, %268 : vector<8x128xf32>
    %270 = math.tanh %269 : vector<8x128xf32>
    %271 = arith.mulf %266, %270 : vector<8x128xf32>
    %c7_i32 = arith.constant 7 : i32
    %272 = arith.index_cast %c7_i32 : i32 to index
    %c0_90 = arith.constant 0 : index
    %c0_91 = arith.constant 0 : index
    %273 = vector.load %arg2[%272, %c0_90, %c0_91] : memref<8x8x512xbf16, #tpu.memory_space<vmem>>, vector<1x8x512xbf16>
    %274 = vector.shape_cast %273 : vector<1x8x512xbf16> to vector<8x512xbf16>
    %275 = arith.extf %274 : vector<8x512xbf16> to vector<8x512xf32>
    %276 = arith.truncf %271 : vector<8x128xf32> to vector<8x128xbf16>
    %cst_92 = arith.constant dense<0.000000e+00> : vector<8x512xf32>
    %277 = tpu.matmul %276, %3, %cst_92 {dimension_numbers = #tpu.dot_dimension_numbers<[1], [0], [0], [1], [0, 0, 1, 1], [], []>} : vector<8x128xbf16>, vector<128x512xbf16>, vector<8x512xf32> -> vector<8x512xf32>
    %278 = arith.addf %275, %277 : vector<8x512xf32>
    %279 = vector.extract_strided_slice %278 {offsets = [0, 0], sizes = [8, 128], strides = [1, 1]} : vector<8x512xf32> to vector<8x128xf32>
    %cst_93 = arith.constant 5.000000e-01 : f32
    %280 = vector.broadcast %cst_93 : f32 to vector<8x128xf32>
    %281 = arith.mulf %280, %279 : vector<8x128xf32>
    %282 = math.tanh %281 : vector<8x128xf32>
    %cst_94 = arith.constant 5.000000e-01 : f32
    %283 = vector.broadcast %cst_94 : f32 to vector<8x128xf32>
    %284 = arith.mulf %283, %282 : vector<8x128xf32>
    %cst_95 = arith.constant 5.000000e-01 : f32
    %285 = vector.broadcast %cst_95 : f32 to vector<8x128xf32>
    %286 = arith.addf %284, %285 : vector<8x128xf32>
    %287 = vector.extract_strided_slice %278 {offsets = [0, 128], sizes = [8, 128], strides = [1, 1]} : vector<8x512xf32> to vector<8x128xf32>
    %cst_96 = arith.constant 5.000000e-01 : f32
    %288 = vector.broadcast %cst_96 : f32 to vector<8x128xf32>
    %289 = arith.mulf %288, %287 : vector<8x128xf32>
    %290 = math.tanh %289 : vector<8x128xf32>
    %cst_97 = arith.constant 5.000000e-01 : f32
    %291 = vector.broadcast %cst_97 : f32 to vector<8x128xf32>
    %292 = arith.mulf %291, %290 : vector<8x128xf32>
    %cst_98 = arith.constant 5.000000e-01 : f32
    %293 = vector.broadcast %cst_98 : f32 to vector<8x128xf32>
    %294 = arith.addf %292, %293 : vector<8x128xf32>
    %295 = vector.extract_strided_slice %278 {offsets = [0, 256], sizes = [8, 128], strides = [1, 1]} : vector<8x512xf32> to vector<8x128xf32>
    %296 = math.tanh %295 : vector<8x128xf32>
    %297 = vector.extract_strided_slice %278 {offsets = [0, 384], sizes = [8, 128], strides = [1, 1]} : vector<8x512xf32> to vector<8x128xf32>
    %cst_99 = arith.constant 5.000000e-01 : f32
    %298 = vector.broadcast %cst_99 : f32 to vector<8x128xf32>
    %299 = arith.mulf %298, %297 : vector<8x128xf32>
    %300 = math.tanh %299 : vector<8x128xf32>
    %cst_100 = arith.constant 5.000000e-01 : f32
    %301 = vector.broadcast %cst_100 : f32 to vector<8x128xf32>
    %302 = arith.mulf %301, %300 : vector<8x128xf32>
    %cst_101 = arith.constant 5.000000e-01 : f32
    %303 = vector.broadcast %cst_101 : f32 to vector<8x128xf32>
    %304 = arith.addf %302, %303 : vector<8x128xf32>
    %305 = arith.mulf %294, %269 : vector<8x128xf32>
    %306 = arith.mulf %286, %296 : vector<8x128xf32>
    %307 = arith.addf %305, %306 : vector<8x128xf32>
    %308 = math.tanh %307 : vector<8x128xf32>
    %309 = arith.mulf %304, %308 : vector<8x128xf32>
    %c8_i32 = arith.constant 8 : i32
    %c0_102 = arith.constant 0 : index
    %c0_103 = arith.constant 0 : index
    %310 = vector.load %arg6[%c0_102, %c0_103] : memref<8x128xf32, #tpu.memory_space<vmem>>, vector<8x128xf32>
    tpu.vector_store %arg6[%c0_102, %c0_103], %309 {strides = array<i32>} : memref<8x128xf32, #tpu.memory_space<vmem>>, vector<8x128xf32>,
    %c0_104 = arith.constant 0 : index
    %c0_105 = arith.constant 0 : index
    %311 = vector.load %arg7[%c0_104, %c0_105] : memref<8x128xf32, #tpu.memory_space<vmem>>, vector<8x128xf32>
    tpu.vector_store %arg7[%c0_104, %c0_105], %307 {strides = array<i32>} : memref<8x128xf32, #tpu.memory_space<vmem>>, vector<8x128xf32>,
    %c0_i32_106 = arith.constant 0 : i32
    %312 = arith.cmpi eq, %arg1, %c0_i32_106 : i32
    %313 = arith.extui %312 : i1 to i32
    %c0_i32_107 = arith.constant 0 : i32
    %314 = arith.cmpi ne, %313, %c0_i32_107 : i32
    scf.if %314 {
      %c0_108 = arith.constant 0 : index
      %c0_109 = arith.constant 0 : index
      %315 = vector.load %arg4[%c0_108, %c0_109] : memref<8x128xf32, #tpu.memory_space<vmem>>, vector<8x128xf32>
      tpu.vector_store %arg4[%c0_108, %c0_109], %309 {strides = array<i32>} : memref<8x128xf32, #tpu.memory_space<vmem>>, vector<8x128xf32>,
    } else {
    }
    return
  }
  func.func @transform_0(%arg0: i32, %arg1: i32) -> (i32, i32, i32) {
    %c0_i32 = arith.constant 0 : i32
    %c0_i32_0 = arith.constant 0 : i32
    return %arg1, %arg0, %c0_i32 : i32, i32, i32
  }
  func.func @transform_2(%arg0: i32, %arg1: i32) -> (i32, i32) {
    %c0_i32 = arith.constant 0 : i32
    %c0_i32_0 = arith.constant 0 : i32
    return %arg0, %c0_i32 : i32, i32
  }
}

</mosaic_0001>

<bundles_post_ra>
// kernel: tpu_custom_call.1
= control target key start
LH: loop header
LB: loop body
LE: loop exit
PB: predicated region body
PF: predicated region fallthrough
CT: control target
= control target key end

     0   :  { %7 = vsyncpa [#allocation6], 0  ;;  %s1615_s0 = inlined_call_operand.hbm [shape: bf16[8,8,512], index: 0, kind: input, shape index: {}]   ;;  %s1616_s1 = inlined_call_operand.hbm [shape: bf16[128,512], index: 1, kind: input, shape index: {}]   ;;  %s1617_s2 = inlined_call_operand.hbm [shape: f32[8,128], index: 2, kind: output, shape index: {}]  }
   0x1   :  { %8 = vsyncpa [#allocation7], 0  ;;  %s13_s11 = sshll.u32 %s1615_s0, 4  ;;  %s1245_s12 = smov [#allocation5]   ;;  %s14_s11 = int_to_ptr.hbm [resolvable:$true] %s13_s11 }
   0x2   :  { %s15_s13 = sshll.u32 %s1245_s12, 4  ;;  %s1246_s14 = smov 256   ;;  %s16_s13 = int_to_ptr.vmem [resolvable:$true] %s15_s13 }
   0x3   :  { %s1247_s15 = smov 16  }
   0x4   :  { %21 = dma.hbm_to_vmem [thread:$0]  %s14_s11, 2048, %s16_s13, [#allocation6], %s1246_s14, %s1246_s14, %s1247_s15  }
   0x5   :  { %1239 = dma.done.wait [#allocation6], 2048  }
   0x6   :  { %1240 = vsyncadd [#allocation6], 4294965248 }
   0x7   :  { %s37_s18 = sshll.u32 %s1616_s1, 4  ;;  %s1248_s19 = smov [#allocation2]   ;;  %s38_s18 = int_to_ptr.hbm [resolvable:$true] %s37_s18 }
   0x8   :  { %s39_s20 = sshll.u32 %s1248_s19, 4  ;;  %s40_s20 = int_to_ptr.vmem [resolvable:$true] %s39_s20 }
   0x9   :  { %42 = dma.hbm_to_vmem [thread:$0]  %s38_s18, 4096, %s40_s20, [#allocation9] }
   0xa   :  { %1241 = dma.done.wait [#allocation9], 4096 }
   0xb   :  { %1242 = vsyncadd [#allocation9], 4294963200  ;;  %v1035_v0 = vld [vmem:[#allocation2 + $0xe0] sm:$0xf]  ;;  %v1079_v1 = vld [vmem:[#allocation2 + $0xec] sm:$0xf0] }
   0xc   :  { %v1077_v2 = vld [vmem:[#allocation2 + $0xe4] sm:$0xf]  ;;  %v1272_v3 = vor.u32 %v1079_v1, %v1035_v0  ;;  %v1037_v4 = vld [vmem:[#allocation2 + $0xf0] sm:$0xf0]  ;;  %v1043_v5 = vld [vmem:[#allocation2 + $0xe8] sm:$0xf] }
   0xd   :  { %v1080_v6 = vld [vmem:[#allocation2 + $0xf4] sm:$0xf0]  ;;  %v1274_v7 = vor.u32 %v1077_v2, %v1037_v4  ;;  %v1078_v9 = vld [vmem:[#allocation2 + $0xec] sm:$0xf]  ;;  %v1045_v10 = vld [vmem:[#allocation2 + $0xf8] sm:$0xf0] }
   0xe   :  { %v1276_v8 = vor.u32 %v1080_v6, %v1043_v5  ;;  %v1019_v11 = vld [vmem:[#allocation2 + $0xc0] sm:$0xf]  ;;  %250 = vmatpush.bf16.msra.mxu0 %v1272_v3  ;;  %v1279_v12 = vor.u32 %v1078_v9, %v1045_v10  ;;  %v1075_v13 = vld [vmem:[#allocation2 + $0xcc] sm:$0xf0]  ;;  %v1073_v14 = vld [vmem:[#allocation2 + $0xc4] sm:$0xf] }
   0xf   :  { %v1021_v15 = vld [vmem:[#allocation2 + $0xd0] sm:$0xf0]  ;;  %263 = vmatpush.bf16.msra.mxu1 %v1274_v7  ;;  %v1283_v16 = vor.u32 %v1075_v13, %v1019_v11  ;;  %v1027_v18 = vld [vmem:[#allocation2 + $0xc8] sm:$0xf]  ;;  %v1076_v19 = vld [vmem:[#allocation2 + $0xd4] sm:$0xf0] }
  0x10   :  { %276 = vmatpush.bf16.msra.mxu2 %v1276_v8  ;;  %v1285_v17 = vor.u32 %v1073_v14, %v1021_v15  ;;  %v1074_v20 = vld [vmem:[#allocation2 + $0xcc] sm:$0xf]  ;;  %289 = vmatpush.bf16.msra.mxu3 %v1279_v12  ;;  %v1288_v21 = vor.u32 %v1076_v19, %v1027_v18  ;;  %v1029_v22 = vld [vmem:[#allocation2 + $0xd8] sm:$0xf0]  ;;  %v1003_v23 = vld [vmem:[#allocation2 + $0xa0] sm:$0xf] }
  0x11   :  { %v1071_v24 = vld [vmem:[#allocation2 + $0xac] sm:$0xf0]  ;;  %v1290_v25 = vor.u32 %v1074_v20, %v1029_v22  ;;  %v1069_v26 = vld [vmem:[#allocation2 + $0xa4] sm:$0xf]  ;;  %v1005_v27 = vld [vmem:[#allocation2 + $0xb0] sm:$0xf0] }
  0x12   :  { %v1011_v28 = vld [vmem:[#allocation2 + $0xa8] sm:$0xf]  ;;  %251 = vmatpush.bf16.msra.mxu0 %v1283_v16  ;;  %v1293_v29 = vor.u32 %v1071_v24, %v1003_v23  ;;  %v1072_v30 = vld [vmem:[#allocation2 + $0xb4] sm:$0xf0]  ;;  %v1070_v31 = vld [vmem:[#allocation2 + $0xac] sm:$0xf]  ;;  %v1297_v33 = vor.u32 %v1069_v26, %v1005_v27 }
  0x13   :  { %v1013_v32 = vld [vmem:[#allocation2 + $0xb8] sm:$0xf0]  ;;  %264 = vmatpush.bf16.msra.mxu1 %v1285_v17  ;;  %v1299_v34 = vor.u32 %v1072_v30, %v1011_v28  ;;  %v987_v35 = vld [vmem:[#allocation2 + $0x80] sm:$0xf]  ;;  %v1067_v36 = vld [vmem:[#allocation2 + $0x8c] sm:$0xf0] }
  0x14   :  { %277 = vmatpush.bf16.msra.mxu2 %v1288_v21  ;;  %v1065_v37 = vld [vmem:[#allocation2 + $0x84] sm:$0xf]  ;;  %290 = vmatpush.bf16.msra.mxu3 %v1290_v25  ;;  %v1302_v38 = vor.u32 %v1070_v31, %v1013_v32  ;;  %v989_v39 = vld [vmem:[#allocation2 + $0x90] sm:$0xf0]  ;;  %v995_v40 = vld [vmem:[#allocation2 + $0x88] sm:$0xf]  ;;  %v1305_v44 = vor.u32 %v1067_v36, %v987_v35 }
  0x15   :  { %v1068_v41 = vld [vmem:[#allocation2 + $0x94] sm:$0xf0]  ;;  %v1066_v42 = vld [vmem:[#allocation2 + $0x8c] sm:$0xf]  ;;  %v997_v43 = vld [vmem:[#allocation2 + $0x98] sm:$0xf0]  ;;  %v1309_v45 = vor.u32 %v1065_v37, %v989_v39 }
  0x16   :  { %252 = vmatpush.bf16.msra.mxu0 %v1293_v29  ;;  %v1311_v46 = vor.u32 %v1068_v41, %v995_v40  ;;  %v971_v47 = vld [vmem:[#allocation2 + $0x60] sm:$0xf]  ;;  %v1063_v48 = vld [vmem:[#allocation2 + $0x6c] sm:$0xf0]  ;;  %v1061_v49 = vld [vmem:[#allocation2 + $0x64] sm:$0xf]  ;;  %v1314_v50 = vor.u32 %v1066_v42, %v997_v43 }
  0x17   :  { %265 = vmatpush.bf16.msra.mxu1 %v1297_v33  ;;  %v973_v51 = vld [vmem:[#allocation2 + $0x70] sm:$0xf0]  ;;  %v979_v52 = vld [vmem:[#allocation2 + $0x68] sm:$0xf]  ;;  %v1064_v53 = vld [vmem:[#allocation2 + $0x74] sm:$0xf0]  ;;  %v1317_v56 = vor.u32 %v1063_v48, %v971_v47 }
  0x18   :  { %278 = vmatpush.bf16.msra.mxu2 %v1299_v34  ;;  %291 = vmatpush.bf16.msra.mxu3 %v1302_v38  ;;  %v1062_v54 = vld [vmem:[#allocation2 + $0x6c] sm:$0xf]  ;;  %v981_v55 = vld [vmem:[#allocation2 + $0x78] sm:$0xf0]  ;;  %v1321_v57 = vor.u32 %v1061_v49, %v973_v51  ;;  %v1323_v58 = vor.u32 %v1064_v53, %v979_v52  ;;  %v955_v59 = vld [vmem:[#allocation2 + $0x40] sm:$0xf] }
  0x19   :  { %v1059_v60 = vld [vmem:[#allocation2 + $0x4c] sm:$0xf0]  ;;  %v1057_v61 = vld [vmem:[#allocation2 + $0x44] sm:$0xf]  ;;  %v1326_v62 = vor.u32 %v1062_v54, %v981_v55  ;;  %v957_v63 = vld [vmem:[#allocation2 + $0x50] sm:$0xf0] }
  0x1a   :  { %253 = vmatpush.bf16.msra.mxu0 %v1305_v44  ;;  %v963_v0 = vld [vmem:[#allocation2 + $0x48] sm:$0xf]  ;;  %v1060_v1 = vld [vmem:[#allocation2 + $0x54] sm:$0xf0]  ;;  %v1058_v2 = vld [vmem:[#allocation2 + $0x4c] sm:$0xf]  ;;  %v1329_v5 = vor.u32 %v1059_v60, %v955_v59  ;;  %v1333_v6 = vor.u32 %v1057_v61, %v957_v63 }
  0x1b   :  { %266 = vmatpush.bf16.msra.mxu1 %v1309_v45  ;;  %v965_v4 = vld [vmem:[#allocation2 + $0x58] sm:$0xf0]  ;;  %v1335_v9 = vor.u32 %v1060_v1, %v963_v0  ;;  %v939_v10 = vld [vmem:[#allocation2 + $0x20] sm:$0xf]  ;;  %v1055_v11 = vld [vmem:[#allocation2 + $0x2c] sm:$0xf0] }
  0x1c   :  { %279 = vmatpush.bf16.msra.mxu2 %v1311_v46  ;;  %292 = vmatpush.bf16.msra.mxu3 %v1314_v50  ;;  %v1053_v13 = vld [vmem:[#allocation2 + $0x24] sm:$0xf]  ;;  %v1338_v14 = vor.u32 %v1058_v2, %v965_v4  ;;  %v941_v15 = vld [vmem:[#allocation2 + $0x30] sm:$0xf0]  ;;  %v947_v18 = vld [vmem:[#allocation2 + $0x28] sm:$0xf]  ;;  %v1341_v23 = vor.u32 %v1055_v11, %v939_v10 }
  0x1d   :  { %v1056_v19 = vld [vmem:[#allocation2 + $0x34] sm:$0xf0]  ;;  %v1054_v20 = vld [vmem:[#allocation2 + $0x2c] sm:$0xf]  ;;  %v949_v22 = vld [vmem:[#allocation2 + $0x38] sm:$0xf0]  ;;  %v1345_v24 = vor.u32 %v1053_v13, %v941_v15 }
  0x1e   :  { %254 = vmatpush.bf16.msra.mxu0 %v1317_v56  ;;  %v1347_v26 = vor.u32 %v1056_v19, %v947_v18  ;;  %v923_v27 = vld [vmem:[#allocation2] sm:$0xf]  ;;  %v1051_v28 = vld [vmem:[#allocation2 + $0xc] sm:$0xf0]  ;;  %v1049_v30 = vld [vmem:[#allocation2 + $0x4] sm:$0xf]  ;;  %v1350_v31 = vor.u32 %v1054_v20, %v949_v22 }
  0x1f   :  { %267 = vmatpush.bf16.msra.mxu1 %v1321_v57  ;;  %v925_v32 = vld [vmem:[#allocation2 + $0x10] sm:$0xf0]  ;;  %v931_v35 = vld [vmem:[#allocation2 + $0x8] sm:$0xf]  ;;  %v1052_v36 = vld [vmem:[#allocation2 + $0x14] sm:$0xf0]  ;;  %v1353_v40 = vor.u32 %v1051_v28, %v923_v27 }
  0x20   :  { %280 = vmatpush.bf16.msra.mxu2 %v1323_v58  ;;  %293 = vmatpush.bf16.msra.mxu3 %v1326_v62  ;;  %v1050_v37 = vld [vmem:[#allocation2 + $0xc] sm:$0xf]  ;;  %v933_v39 = vld [vmem:[#allocation2 + $0x18] sm:$0xf0]  ;;  %v1357_v41 = vor.u32 %v1049_v30, %v925_v32  ;;  %v1359_v42 = vor.u32 %v1052_v36, %v931_v35  ;;  %v1249_v47 = vmov 0.0|0.0   ;;  %v83_v48 = vld [vmem:[#allocation5] sm:$0xff] }
  0x21   :  { %v1362_v43 = vor.u32 %v1050_v37, %v933_v39  ;;  %v85_v49 = vunpack.c.l.bf16 %v83_v48  ;;  %v86_v51 = vunpack.c.h.bf16 %v83_v48  ;;  %v84_v55 = vld [vmem:[#allocation5 + $0x8] sm:$0xff]  ;;  %s1250_s0 = smov [#allocation8]   ;;  %s911_s23 = sshll.u32 %s1617_s2, 4  ;;  %s912_s23 = int_to_ptr.hbm [resolvable:$true] %s911_s23 }
  0x22   :  { %255 = vmatpush.bf16.msra.mxu0 %v1329_v5  ;;  %v87_v63 = vunpack.c.l.bf16 %v84_v55  ;;  %v88_v0 = vunpack.c.h.bf16 %v84_v55  ;;  %s909_s1 = sshll.u32 %s1250_s0, 4  ;;  %s910_s1 = int_to_ptr.vmem [resolvable:$true] %s909_s1 }
  0x23   :  { %268 = vmatpush.bf16.msra.mxu1 %v1333_v6 }
  0x24   :  { %281 = vmatpush.bf16.msra.mxu2 %v1335_v9  ;;  %294 = vmatpush.bf16.msra.mxu3 %v1338_v14 }
  0x26   :  { %256 = vmatpush.bf16.msra.mxu0 %v1341_v23 }
  0x27   :  { %269 = vmatpush.bf16.msra.mxu1 %v1345_v24 }
  0x28   :  { %282 = vmatpush.bf16.msra.mxu2 %v1347_v26  ;;  %295 = vmatpush.bf16.msra.mxu3 %v1350_v31 }
  0x2a   :  { %257 = vmatpush.bf16.msra.mxu0 %v1353_v40 }
  0x2b   :  { %270 = vmatpush.bf16.msra.mxu1 %v1357_v41 }
  0x2c   :  { %283 = vmatpush.bf16.msra.mxu2 %v1359_v42  ;;  %296 = vmatpush.bf16.msra.mxu3 %v1362_v43 }
  0x2d   :  { %258 = vmatmul.bf16.vlgmr.msra.gmra.mxu0 %v1249_v47 }
  0x2e   :  { %332 = vmatpush.bf16.msrb.mxu0 %v1272_v3  ;;  %271 = vmatmul.bf16.vlgmr.msra.gmra.mxu1 %v1249_v47 }
  0x2f   :  { %345 = vmatpush.bf16.msrb.mxu1 %v1274_v7  ;;  %284 = vmatmul.bf16.vlgmr.msra.gmra.mxu2 %v1249_v47 }
  0x30   :  { %297 = vmatmul.bf16.vlgmr.msra.gmra.mxu3 %v1249_v47  ;;  %358 = vmatpush.bf16.msrb.mxu2 %v1276_v8 }
  0x31   :  { %371 = vmatpush.bf16.msrb.mxu3 %v1279_v12 }
  0x32   :  { %333 = vmatpush.bf16.msrb.mxu0 %v1283_v16 }
  0x33   :  { %346 = vmatpush.bf16.msrb.mxu1 %v1285_v17 }
  0x34   :  { %359 = vmatpush.bf16.msrb.mxu2 %v1288_v21 }
  0x35   :  { %372 = vmatpush.bf16.msrb.mxu3 %v1290_v25 }
  0x36   :  { %334 = vmatpush.bf16.msrb.mxu0 %v1293_v29 }
  0x37   :  { %347 = vmatpush.bf16.msrb.mxu1 %v1297_v33 }
  0x38   :  { %360 = vmatpush.bf16.msrb.mxu2 %v1299_v34 }
  0x39   :  { %373 = vmatpush.bf16.msrb.mxu3 %v1302_v38 }
  0x3a   :  { %335 = vmatpush.bf16.msrb.mxu0 %v1305_v44 }
  0x3b   :  { %348 = vmatpush.bf16.msrb.mxu1 %v1309_v45 }
  0x3c   :  { %361 = vmatpush.bf16.msrb.mxu2 %v1311_v46 }
  0x3d   :  { %374 = vmatpush.bf16.msrb.mxu3 %v1314_v50 }
  0x3e   :  { %336 = vmatpush.bf16.msrb.mxu0 %v1317_v56 }
  0x3f   :  { %349 = vmatpush.bf16.msrb.mxu1 %v1321_v57 }
  0x40   :  { %362 = vmatpush.bf16.msrb.mxu2 %v1323_v58 }
  0x41   :  { %375 = vmatpush.bf16.msrb.mxu3 %v1326_v62 }
  0x42   :  { %337 = vmatpush.bf16.msrb.mxu0 %v1329_v5 }
  0x43   :  { %350 = vmatpush.bf16.msrb.mxu1 %v1333_v6 }
  0x44   :  { %363 = vmatpush.bf16.msrb.mxu2 %v1335_v9 }
  0x45   :  { %376 = vmatpush.bf16.msrb.mxu3 %v1338_v14 }
  0x46   :  { %338 = vmatpush.bf16.msrb.mxu0 %v1341_v23 }
  0x47   :  { %351 = vmatpush.bf16.msrb.mxu1 %v1345_v24 }
  0x48   :  { %364 = vmatpush.bf16.msrb.mxu2 %v1347_v26 }
  0x49   :  { %377 = vmatpush.bf16.msrb.mxu3 %v1350_v31 }
  0x4a   :  { %339 = vmatpush.bf16.msrb.mxu0 %v1353_v40 }
  0x4b   :  { %352 = vmatpush.bf16.msrb.mxu1 %v1357_v41 }
  0x4c   :  { %365 = vmatpush.bf16.msrb.mxu2 %v1359_v42 }
  0x4d   :  { %378 = vmatpush.bf16.msrb.mxu3 %v1362_v43 }
  0x4e   :  { %414 = vmatpush.bf16.msra.mxu0 %v1272_v3 }
  0x4f   :  { %427 = vmatpush.bf16.msra.mxu1 %v1274_v7 }
  0x50   :  { %440 = vmatpush.bf16.msra.mxu2 %v1276_v8 }
  0x51   :  { %453 = vmatpush.bf16.msra.mxu3 %v1279_v12 }
  0x52   :  { %415 = vmatpush.bf16.msra.mxu0 %v1283_v16 }
  0x53   :  { %428 = vmatpush.bf16.msra.mxu1 %v1285_v17 }
  0x54   :  { %441 = vmatpush.bf16.msra.mxu2 %v1288_v21 }
  0x55   :  { %454 = vmatpush.bf16.msra.mxu3 %v1290_v25 }
  0x56   :  { %416 = vmatpush.bf16.msra.mxu0 %v1293_v29 }
  0x57   :  { %429 = vmatpush.bf16.msra.mxu1 %v1297_v33 }
  0x58   :  { %442 = vmatpush.bf16.msra.mxu2 %v1299_v34 }
  0x59   :  { %455 = vmatpush.bf16.msra.mxu3 %v1302_v38 }
  0x5a   :  { %417 = vmatpush.bf16.msra.mxu0 %v1305_v44 }
  0x5b   :  { %430 = vmatpush.bf16.msra.mxu1 %v1309_v45 }
  0x5c   :  { %443 = vmatpush.bf16.msra.mxu2 %v1311_v46 }
  0x5d   :  { %456 = vmatpush.bf16.msra.mxu3 %v1314_v50 }
  0x5e   :  { %418 = vmatpush.bf16.msra.mxu0 %v1317_v56 }
  0x5f   :  { %431 = vmatpush.bf16.msra.mxu1 %v1321_v57 }
  0x60   :  { %444 = vmatpush.bf16.msra.mxu2 %v1323_v58 }
  0x61   :  { %457 = vmatpush.bf16.msra.mxu3 %v1326_v62 }
  0x62   :  { %419 = vmatpush.bf16.msra.mxu0 %v1329_v5 }
  0x63   :  { %432 = vmatpush.bf16.msra.mxu1 %v1333_v6 }
  0x64   :  { %445 = vmatpush.bf16.msra.mxu2 %v1335_v9 }
  0x65   :  { %458 = vmatpush.bf16.msra.mxu3 %v1338_v14 }
  0x66   :  { %420 = vmatpush.bf16.msra.mxu0 %v1341_v23 }
  0x67   :  { %433 = vmatpush.bf16.msra.mxu1 %v1345_v24 }
  0x68   :  { %446 = vmatpush.bf16.msra.mxu2 %v1347_v26 }
  0x69   :  { %459 = vmatpush.bf16.msra.mxu3 %v1350_v31 }
  0x6a   :  { %421 = vmatpush.bf16.msra.mxu0 %v1353_v40 }
  0x6b   :  { %434 = vmatpush.bf16.msra.mxu1 %v1357_v41 }
  0x6c   :  { %447 = vmatpush.bf16.msra.mxu2 %v1359_v42 }
  0x6d   :  { %460 = vmatpush.bf16.msra.mxu3 %v1362_v43 }
  0xaa   :  { %v259_v52 = vpop.f32.mrf.mxu0 }
  0xab   :  { %v302_v53 = vadd.f32 %v259_v52, %v85_v49  ;;  %v272_v54 = vpop.f32.mrf.mxu1 }
  0xac   :  { %v303_v59 = vadd.f32 %v272_v54, %v86_v51  ;;  %v325_v54 = vld [vmem:[#allocation5 + $0x10] sm:$0xff] }
  0xad   :  { %v306_v60 = vmul.f32 0.5, %v302_v53  ;;  %v327_v55 = vunpack.c.l.bf16 %v325_v54 }
  0xae   :  { %v310_v61 = vmul.f32 0.5, %v303_v59  ;;  %v328_v59 = vunpack.c.h.bf16 %v325_v54 }
  0xaf   :  { %1087 = vtanh.f32 %v306_v60 }
  0xb0   :  { %1089 = vtanh.f32 %v310_v61 }
  0xb2   :  { %v285_v1 = vpop.f32.mrf.mxu2  ;;  %v261_v10 = vpop.f32.mrf.mxu0 }
  0xb3   :  { %v304_v2 = vadd.f32 %v285_v1, %v87_v63  ;;  %v298_v4 = vpop.f32.mrf.mxu3  ;;  %v274_v13 = vpop.f32.mrf.mxu1  ;;  %v326_v1 = vld [vmem:[#allocation5 + $0x18] sm:$0xff] }
  0xb4   :  { %v305_v11 = vadd.f32 %v298_v4, %v88_v0  ;;  %v329_v10 = vunpack.c.l.bf16 %v326_v1 }
  0xb5   :  { %1091 = vtanh.f32 %v304_v2  ;;  %v1088_v15 = vpop.eup %1087 }
  0xb6   :  { %v315_v18 = vmul.f32 0.5, %v305_v11  ;;  %v1090_v19 = vpop.eup %1089  ;;  %v308_v20 = vmul.f32 0.5, %v1088_v15  ;;  %v330_v11 = vunpack.c.h.bf16 %v326_v1 }
  0xb7   :  { %v312_v22 = vmul.f32 0.5, %v1090_v19 }
  0xb8   :  { %1093 = vtanh.f32 %v315_v18  ;;  %v309_v27 = vadd.f32 0.5, %v308_v20 }
  0xb9   :  { %v313_v28 = vadd.f32 0.5, %v312_v22 }
  0xba   :  { %v287_v30 = vpop.f32.mrf.mxu2 }
  0xbb   :  { %v1092_v32 = vpop.eup %1091  ;;  %v300_v35 = vpop.f32.mrf.mxu3  ;;  %v319_v36 = vmul.f32 0.0, %v313_v28 }
  0xbc   :  { %v320_v37 = vmul.f32 %v1092_v32, %v309_v27 }
  0xbe   :  { %v1094_v39 = vpop.eup %1093  ;;  %v1432_v47 = vadd.f32 %v320_v37, %v319_v36 }
  0xbf   :  { %v317_v48 = vmul.f32 0.5, %v1094_v39 }
  0xc0   :  { %1095 = vtanh.f32 %v1432_v47 }
  0xc1   :  { %v318_v49 = vadd.f32 0.5, %v317_v48 }
  0xc6   :  { %v1096_v51 = vpop.eup %1095 }
  0xc7   :  { %v323_v52 = vmul.f32 %v1096_v51, %v318_v49 }
  0xc9   :  { %v331_v53 = vpack.c.bf16 %v323_v52, %v323_v52 }
  0xcb   :  { %340 = vmatmul.bf16.vlgmr.msrb.gmra.mxu0 %v331_v53  ;;  %353 = vmatmul.bf16.vlgmr.msrb.gmra.mxu1 %v331_v53 }
  0xcc   :  { %366 = vmatmul.bf16.vlgmr.msrb.gmra.mxu2 %v331_v53  ;;  %379 = vmatmul.bf16.vlgmr.msrb.gmra.mxu3 %v331_v53 }
  0xcd   :  { %496 = vmatpush.bf16.msrb.mxu0 %v1272_v3  ;;  %509 = vmatpush.bf16.msrb.mxu1 %v1274_v7 }
  0xce   :  { %522 = vmatpush.bf16.msrb.mxu2 %v1276_v8  ;;  %535 = vmatpush.bf16.msrb.mxu3 %v1279_v12 }
  0xd1   :  { %497 = vmatpush.bf16.msrb.mxu0 %v1283_v16  ;;  %510 = vmatpush.bf16.msrb.mxu1 %v1285_v17 }
  0xd2   :  { %523 = vmatpush.bf16.msrb.mxu2 %v1288_v21  ;;  %536 = vmatpush.bf16.msrb.mxu3 %v1290_v25 }
  0xd5   :  { %498 = vmatpush.bf16.msrb.mxu0 %v1293_v29  ;;  %511 = vmatpush.bf16.msrb.mxu1 %v1297_v33 }
  0xd6   :  { %524 = vmatpush.bf16.msrb.mxu2 %v1299_v34  ;;  %537 = vmatpush.bf16.msrb.mxu3 %v1302_v38 }
  0xd9   :  { %499 = vmatpush.bf16.msrb.mxu0 %v1305_v44  ;;  %512 = vmatpush.bf16.msrb.mxu1 %v1309_v45 }
  0xda   :  { %525 = vmatpush.bf16.msrb.mxu2 %v1311_v46  ;;  %538 = vmatpush.bf16.msrb.mxu3 %v1314_v50 }
  0xdd   :  { %500 = vmatpush.bf16.msrb.mxu0 %v1317_v56  ;;  %513 = vmatpush.bf16.msrb.mxu1 %v1321_v57 }
  0xde   :  { %526 = vmatpush.bf16.msrb.mxu2 %v1323_v58  ;;  %539 = vmatpush.bf16.msrb.mxu3 %v1326_v62 }
  0xe1   :  { %501 = vmatpush.bf16.msrb.mxu0 %v1329_v5  ;;  %514 = vmatpush.bf16.msrb.mxu1 %v1333_v6 }
  0xe2   :  { %527 = vmatpush.bf16.msrb.mxu2 %v1335_v9  ;;  %540 = vmatpush.bf16.msrb.mxu3 %v1338_v14 }
  0xe5   :  { %502 = vmatpush.bf16.msrb.mxu0 %v1341_v23  ;;  %515 = vmatpush.bf16.msrb.mxu1 %v1345_v24 }
  0xe6   :  { %528 = vmatpush.bf16.msrb.mxu2 %v1347_v26  ;;  %541 = vmatpush.bf16.msrb.mxu3 %v1350_v31 }
  0xe9   :  { %503 = vmatpush.bf16.msrb.mxu0 %v1353_v40  ;;  %516 = vmatpush.bf16.msrb.mxu1 %v1357_v41 }
  0xea   :  { %529 = vmatpush.bf16.msrb.mxu2 %v1359_v42  ;;  %542 = vmatpush.bf16.msrb.mxu3 %v1362_v43 }
 0x148   :  { %v341_v60 = vpop.f32.mrf.mxu0  ;;  %v354_v61 = vpop.f32.mrf.mxu1 }
 0x149   :  { %v384_v63 = vadd.f32 %v341_v60, %v327_v55  ;;  %v385_v0 = vadd.f32 %v354_v61, %v328_v59 }
 0x14b   :  { %v388_v2 = vmul.f32 0.5, %v384_v63  ;;  %v392_v4 = vmul.f32 0.5, %v385_v0 }
 0x14d   :  { %1097 = vtanh.f32 %v388_v2 }
 0x14e   :  { %1099 = vtanh.f32 %v392_v4 }
 0x14f   :  { %v367_v13 = vpop.f32.mrf.mxu2  ;;  %v380_v15 = vpop.f32.mrf.mxu3 }
 0x150   :  { %v386_v18 = vadd.f32 %v367_v13, %v329_v10  ;;  %v387_v19 = vadd.f32 %v380_v15, %v330_v11  ;;  %v343_v20 = vpop.f32.mrf.mxu0  ;;  %v356_v22 = vpop.f32.mrf.mxu1  ;;  %v408_v13 = vld [vmem:[#allocation5 + $0x28] sm:$0xff] }
 0x151   :  { %v412_v20 = vunpack.c.h.bf16 %v408_v13 }
 0x152   :  { %1101 = vtanh.f32 %v386_v18  ;;  %v397_v27 = vmul.f32 0.5, %v387_v19  ;;  %v411_v19 = vunpack.c.l.bf16 %v408_v13 }
 0x153   :  { %v1098_v28 = vpop.eup %1097 }
 0x154   :  { %v1100_v30 = vpop.eup %1099  ;;  %v390_v32 = vmul.f32 0.5, %v1098_v28  ;;  %1103 = vtanh.f32 %v397_v27 }
 0x155   :  { %v394_v35 = vmul.f32 0.5, %v1100_v30 }
 0x156   :  { %v391_v36 = vadd.f32 0.5, %v390_v32 }
 0x157   :  { %v395_v37 = vadd.f32 0.5, %v394_v35  ;;  %v369_v39 = vpop.f32.mrf.mxu2  ;;  %v382_v48 = vpop.f32.mrf.mxu3 }
 0x158   :  { %v1102_v49 = vpop.eup %1101 }
 0x159   :  { %v401_v51 = vmul.f32 %v395_v37, %v1432_v47  ;;  %v402_v52 = vmul.f32 %v1102_v49, %v391_v36  ;;  %v407_v47 = vld [vmem:[#allocation5 + $0x20] sm:$0xff] }
 0x15a   :  { %v1104_v53 = vpop.eup %1103  ;;  %v409_v0 = vunpack.c.l.bf16 %v407_v47  ;;  %v410_v1 = vunpack.c.h.bf16 %v407_v47 }
 0x15b   :  { %v1468_v54 = vadd.f32 %v402_v52, %v401_v51  ;;  %v399_v55 = vmul.f32 0.5, %v1104_v53 }
 0x15d   :  { %1105 = vtanh.f32 %v1468_v54  ;;  %v400_v59 = vadd.f32 0.5, %v399_v55 }
 0x163   :  { %v1106_v60 = vpop.eup %1105 }
 0x164   :  { %v405_v61 = vmul.f32 %v1106_v60, %v400_v59 }
 0x166   :  { %v413_v63 = vpack.c.bf16 %v405_v61, %v405_v61 }
 0x168   :  { %422 = vmatmul.bf16.vlgmr.msra.gmra.mxu0 %v413_v63  ;;  %435 = vmatmul.bf16.vlgmr.msra.gmra.mxu1 %v413_v63 }
 0x169   :  { %448 = vmatmul.bf16.vlgmr.msra.gmra.mxu2 %v413_v63  ;;  %461 = vmatmul.bf16.vlgmr.msra.gmra.mxu3 %v413_v63 }
 0x16a   :  { %578 = vmatpush.bf16.msra.mxu0 %v1272_v3  ;;  %591 = vmatpush.bf16.msra.mxu1 %v1274_v7 }
 0x16b   :  { %604 = vmatpush.bf16.msra.mxu2 %v1276_v8  ;;  %617 = vmatpush.bf16.msra.mxu3 %v1279_v12 }
 0x16e   :  { %579 = vmatpush.bf16.msra.mxu0 %v1283_v16  ;;  %592 = vmatpush.bf16.msra.mxu1 %v1285_v17 }
 0x16f   :  { %605 = vmatpush.bf16.msra.mxu2 %v1288_v21  ;;  %618 = vmatpush.bf16.msra.mxu3 %v1290_v25 }
 0x172   :  { %580 = vmatpush.bf16.msra.mxu0 %v1293_v29  ;;  %593 = vmatpush.bf16.msra.mxu1 %v1297_v33 }
 0x173   :  { %606 = vmatpush.bf16.msra.mxu2 %v1299_v34  ;;  %619 = vmatpush.bf16.msra.mxu3 %v1302_v38 }
 0x176   :  { %581 = vmatpush.bf16.msra.mxu0 %v1305_v44  ;;  %594 = vmatpush.bf16.msra.mxu1 %v1309_v45 }
 0x177   :  { %607 = vmatpush.bf16.msra.mxu2 %v1311_v46  ;;  %620 = vmatpush.bf16.msra.mxu3 %v1314_v50 }
 0x17a   :  { %582 = vmatpush.bf16.msra.mxu0 %v1317_v56  ;;  %595 = vmatpush.bf16.msra.mxu1 %v1321_v57 }
 0x17b   :  { %608 = vmatpush.bf16.msra.mxu2 %v1323_v58  ;;  %621 = vmatpush.bf16.msra.mxu3 %v1326_v62 }
 0x17e   :  { %583 = vmatpush.bf16.msra.mxu0 %v1329_v5  ;;  %596 = vmatpush.bf16.msra.mxu1 %v1333_v6 }
 0x17f   :  { %609 = vmatpush.bf16.msra.mxu2 %v1335_v9  ;;  %622 = vmatpush.bf16.msra.mxu3 %v1338_v14 }
 0x182   :  { %584 = vmatpush.bf16.msra.mxu0 %v1341_v23  ;;  %597 = vmatpush.bf16.msra.mxu1 %v1345_v24 }
 0x183   :  { %610 = vmatpush.bf16.msra.mxu2 %v1347_v26  ;;  %623 = vmatpush.bf16.msra.mxu3 %v1350_v31 }
 0x186   :  { %585 = vmatpush.bf16.msra.mxu0 %v1353_v40  ;;  %598 = vmatpush.bf16.msra.mxu1 %v1357_v41 }
 0x187   :  { %611 = vmatpush.bf16.msra.mxu2 %v1359_v42  ;;  %624 = vmatpush.bf16.msra.mxu3 %v1362_v43 }
 0x1e5   :  { %v423_v2 = vpop.f32.mrf.mxu0  ;;  %v436_v4 = vpop.f32.mrf.mxu1 }
 0x1e6   :  { %v466_v10 = vadd.f32 %v423_v2, %v409_v0  ;;  %v467_v11 = vadd.f32 %v436_v4, %v410_v1 }
 0x1e8   :  { %v470_v15 = vmul.f32 0.5, %v466_v10  ;;  %v474_v18 = vmul.f32 0.5, %v467_v11 }
 0x1ea   :  { %1107 = vtanh.f32 %v470_v15 }
 0x1eb   :  { %1109 = vtanh.f32 %v474_v18 }
 0x1ec   :  { %v449_v22 = vpop.f32.mrf.mxu2  ;;  %v462_v27 = vpop.f32.mrf.mxu3 }
 0x1ed   :  { %v468_v28 = vadd.f32 %v449_v22, %v411_v19  ;;  %v469_v30 = vadd.f32 %v462_v27, %v412_v20  ;;  %v425_v32 = vpop.f32.mrf.mxu0  ;;  %v438_v35 = vpop.f32.mrf.mxu1  ;;  %v490_v22 = vld [vmem:[#allocation5 + $0x38] sm:$0xff] }
 0x1ee   :  { %v494_v32 = vunpack.c.h.bf16 %v490_v22 }
 0x1ef   :  { %1111 = vtanh.f32 %v468_v28  ;;  %v479_v36 = vmul.f32 0.5, %v469_v30  ;;  %v493_v30 = vunpack.c.l.bf16 %v490_v22 }
 0x1f0   :  { %v1108_v37 = vpop.eup %1107 }
 0x1f1   :  { %v1110_v39 = vpop.eup %1109  ;;  %v472_v48 = vmul.f32 0.5, %v1108_v37  ;;  %1113 = vtanh.f32 %v479_v36 }
 0x1f2   :  { %v476_v49 = vmul.f32 0.5, %v1110_v39 }
 0x1f3   :  { %v473_v51 = vadd.f32 0.5, %v472_v48 }
 0x1f4   :  { %v477_v52 = vadd.f32 0.5, %v476_v49  ;;  %v451_v53 = vpop.f32.mrf.mxu2  ;;  %v464_v55 = vpop.f32.mrf.mxu3 }
 0x1f5   :  { %v1112_v59 = vpop.eup %1111 }
 0x1f6   :  { %v483_v60 = vmul.f32 %v477_v52, %v1468_v54  ;;  %v484_v61 = vmul.f32 %v1112_v59, %v473_v51  ;;  %v489_v54 = vld [vmem:[#allocation5 + $0x30] sm:$0xff] }
 0x1f7   :  { %v1114_v63 = vpop.eup %1113  ;;  %v491_v11 = vunpack.c.l.bf16 %v489_v54  ;;  %v492_v13 = vunpack.c.h.bf16 %v489_v54 }
 0x1f8   :  { %v1504_v47 = vadd.f32 %v484_v61, %v483_v60  ;;  %v481_v0 = vmul.f32 0.5, %v1114_v63 }
 0x1fa   :  { %1115 = vtanh.f32 %v1504_v47  ;;  %v482_v1 = vadd.f32 0.5, %v481_v0 }
 0x200   :  { %v1116_v2 = vpop.eup %1115 }
 0x201   :  { %v487_v4 = vmul.f32 %v1116_v2, %v482_v1 }
 0x203   :  { %v495_v10 = vpack.c.bf16 %v487_v4, %v487_v4 }
 0x205   :  { %504 = vmatmul.bf16.vlgmr.msrb.gmra.mxu0 %v495_v10  ;;  %517 = vmatmul.bf16.vlgmr.msrb.gmra.mxu1 %v495_v10 }
 0x206   :  { %530 = vmatmul.bf16.vlgmr.msrb.gmra.mxu2 %v495_v10  ;;  %543 = vmatmul.bf16.vlgmr.msrb.gmra.mxu3 %v495_v10 }
 0x207   :  { %660 = vmatpush.bf16.msrb.mxu0 %v1272_v3  ;;  %673 = vmatpush.bf16.msrb.mxu1 %v1274_v7 }
 0x208   :  { %686 = vmatpush.bf16.msrb.mxu2 %v1276_v8  ;;  %699 = vmatpush.bf16.msrb.mxu3 %v1279_v12 }
 0x20b   :  { %661 = vmatpush.bf16.msrb.mxu0 %v1283_v16  ;;  %674 = vmatpush.bf16.msrb.mxu1 %v1285_v17 }
 0x20c   :  { %687 = vmatpush.bf16.msrb.mxu2 %v1288_v21  ;;  %700 = vmatpush.bf16.msrb.mxu3 %v1290_v25 }
 0x20f   :  { %662 = vmatpush.bf16.msrb.mxu0 %v1293_v29  ;;  %675 = vmatpush.bf16.msrb.mxu1 %v1297_v33 }
 0x210   :  { %688 = vmatpush.bf16.msrb.mxu2 %v1299_v34  ;;  %701 = vmatpush.bf16.msrb.mxu3 %v1302_v38 }
 0x213   :  { %663 = vmatpush.bf16.msrb.mxu0 %v1305_v44  ;;  %676 = vmatpush.bf16.msrb.mxu1 %v1309_v45 }
 0x214   :  { %689 = vmatpush.bf16.msrb.mxu2 %v1311_v46  ;;  %702 = vmatpush.bf16.msrb.mxu3 %v1314_v50 }
 0x217   :  { %664 = vmatpush.bf16.msrb.mxu0 %v1317_v56  ;;  %677 = vmatpush.bf16.msrb.mxu1 %v1321_v57 }
 0x218   :  { %690 = vmatpush.bf16.msrb.mxu2 %v1323_v58  ;;  %703 = vmatpush.bf16.msrb.mxu3 %v1326_v62 }
 0x21b   :  { %665 = vmatpush.bf16.msrb.mxu0 %v1329_v5  ;;  %678 = vmatpush.bf16.msrb.mxu1 %v1333_v6 }
 0x21c   :  { %691 = vmatpush.bf16.msrb.mxu2 %v1335_v9  ;;  %704 = vmatpush.bf16.msrb.mxu3 %v1338_v14 }
 0x21f   :  { %666 = vmatpush.bf16.msrb.mxu0 %v1341_v23  ;;  %679 = vmatpush.bf16.msrb.mxu1 %v1345_v24 }
 0x220   :  { %692 = vmatpush.bf16.msrb.mxu2 %v1347_v26  ;;  %705 = vmatpush.bf16.msrb.mxu3 %v1350_v31 }
 0x223   :  { %667 = vmatpush.bf16.msrb.mxu0 %v1353_v40  ;;  %680 = vmatpush.bf16.msrb.mxu1 %v1357_v41 }
 0x224   :  { %693 = vmatpush.bf16.msrb.mxu2 %v1359_v42  ;;  %706 = vmatpush.bf16.msrb.mxu3 %v1362_v43 }
 0x282   :  { %v505_v15 = vpop.f32.mrf.mxu0  ;;  %v518_v18 = vpop.f32.mrf.mxu1 }
 0x283   :  { %v548_v19 = vadd.f32 %v505_v15, %v491_v11  ;;  %v549_v20 = vadd.f32 %v518_v18, %v492_v13 }
 0x285   :  { %v552_v27 = vmul.f32 0.5, %v548_v19  ;;  %v556_v28 = vmul.f32 0.5, %v549_v20 }
 0x287   :  { %1117 = vtanh.f32 %v552_v27 }
 0x288   :  { %1119 = vtanh.f32 %v556_v28 }
 0x289   :  { %v531_v35 = vpop.f32.mrf.mxu2  ;;  %v544_v36 = vpop.f32.mrf.mxu3 }
 0x28a   :  { %v550_v37 = vadd.f32 %v531_v35, %v493_v30  ;;  %v551_v39 = vadd.f32 %v544_v36, %v494_v32  ;;  %v507_v48 = vpop.f32.mrf.mxu0  ;;  %v520_v49 = vpop.f32.mrf.mxu1  ;;  %v572_v35 = vld [vmem:[#allocation5 + $0x48] sm:$0xff] }
 0x28b   :  { %v576_v48 = vunpack.c.h.bf16 %v572_v35 }
 0x28c   :  { %1121 = vtanh.f32 %v550_v37  ;;  %v561_v51 = vmul.f32 0.5, %v551_v39  ;;  %v575_v39 = vunpack.c.l.bf16 %v572_v35 }
 0x28d   :  { %v1118_v52 = vpop.eup %1117 }
 0x28e   :  { %v1120_v53 = vpop.eup %1119  ;;  %v554_v55 = vmul.f32 0.5, %v1118_v52  ;;  %1123 = vtanh.f32 %v561_v51 }
 0x28f   :  { %v558_v59 = vmul.f32 0.5, %v1120_v53 }
 0x290   :  { %v555_v60 = vadd.f32 0.5, %v554_v55 }
 0x291   :  { %v559_v61 = vadd.f32 0.5, %v558_v59  ;;  %v533_v63 = vpop.f32.mrf.mxu2  ;;  %v546_v0 = vpop.f32.mrf.mxu3 }
 0x292   :  { %v1122_v1 = vpop.eup %1121 }
 0x293   :  { %v565_v2 = vmul.f32 %v559_v61, %v1504_v47  ;;  %v566_v4 = vmul.f32 %v1122_v1, %v555_v60  ;;  %v571_v47 = vld [vmem:[#allocation5 + $0x40] sm:$0xff] }
 0x294   :  { %v1124_v10 = vpop.eup %1123  ;;  %v573_v20 = vunpack.c.l.bf16 %v571_v47  ;;  %v574_v22 = vunpack.c.h.bf16 %v571_v47 }
 0x295   :  { %v1540_v54 = vadd.f32 %v566_v4, %v565_v2  ;;  %v563_v11 = vmul.f32 0.5, %v1124_v10 }
 0x297   :  { %1125 = vtanh.f32 %v1540_v54  ;;  %v564_v13 = vadd.f32 0.5, %v563_v11 }
 0x29d   :  { %v1126_v15 = vpop.eup %1125 }
 0x29e   :  { %v569_v18 = vmul.f32 %v1126_v15, %v564_v13 }
 0x2a0   :  { %v577_v19 = vpack.c.bf16 %v569_v18, %v569_v18 }
 0x2a2   :  { %586 = vmatmul.bf16.vlgmr.msra.gmra.mxu0 %v577_v19  ;;  %599 = vmatmul.bf16.vlgmr.msra.gmra.mxu1 %v577_v19 }
 0x2a3   :  { %612 = vmatmul.bf16.vlgmr.msra.gmra.mxu2 %v577_v19  ;;  %625 = vmatmul.bf16.vlgmr.msra.gmra.mxu3 %v577_v19 }
 0x2a4   :  { %742 = vmatpush.bf16.msra.mxu0 %v1272_v3  ;;  %755 = vmatpush.bf16.msra.mxu1 %v1274_v7 }
 0x2a5   :  { %768 = vmatpush.bf16.msra.mxu2 %v1276_v8  ;;  %781 = vmatpush.bf16.msra.mxu3 %v1279_v12 }
 0x2a8   :  { %743 = vmatpush.bf16.msra.mxu0 %v1283_v16  ;;  %756 = vmatpush.bf16.msra.mxu1 %v1285_v17 }
 0x2a9   :  { %769 = vmatpush.bf16.msra.mxu2 %v1288_v21  ;;  %782 = vmatpush.bf16.msra.mxu3 %v1290_v25 }
 0x2ac   :  { %744 = vmatpush.bf16.msra.mxu0 %v1293_v29  ;;  %757 = vmatpush.bf16.msra.mxu1 %v1297_v33 }
 0x2ad   :  { %770 = vmatpush.bf16.msra.mxu2 %v1299_v34  ;;  %783 = vmatpush.bf16.msra.mxu3 %v1302_v38 }
 0x2b0   :  { %745 = vmatpush.bf16.msra.mxu0 %v1305_v44  ;;  %758 = vmatpush.bf16.msra.mxu1 %v1309_v45 }
 0x2b1   :  { %771 = vmatpush.bf16.msra.mxu2 %v1311_v46  ;;  %784 = vmatpush.bf16.msra.mxu3 %v1314_v50 }
 0x2b4   :  { %746 = vmatpush.bf16.msra.mxu0 %v1317_v56  ;;  %759 = vmatpush.bf16.msra.mxu1 %v1321_v57 }
 0x2b5   :  { %772 = vmatpush.bf16.msra.mxu2 %v1323_v58  ;;  %785 = vmatpush.bf16.msra.mxu3 %v1326_v62 }
 0x2b8   :  { %747 = vmatpush.bf16.msra.mxu0 %v1329_v5  ;;  %760 = vmatpush.bf16.msra.mxu1 %v1333_v6 }
 0x2b9   :  { %773 = vmatpush.bf16.msra.mxu2 %v1335_v9  ;;  %786 = vmatpush.bf16.msra.mxu3 %v1338_v14 }
 0x2bc   :  { %748 = vmatpush.bf16.msra.mxu0 %v1341_v23  ;;  %761 = vmatpush.bf16.msra.mxu1 %v1345_v24 }
 0x2bd   :  { %774 = vmatpush.bf16.msra.mxu2 %v1347_v26  ;;  %787 = vmatpush.bf16.msra.mxu3 %v1350_v31 }
 0x2c0   :  { %749 = vmatpush.bf16.msra.mxu0 %v1353_v40  ;;  %762 = vmatpush.bf16.msra.mxu1 %v1357_v41 }
 0x2c1   :  { %775 = vmatpush.bf16.msra.mxu2 %v1359_v42  ;;  %788 = vmatpush.bf16.msra.mxu3 %v1362_v43 }
 0x31f   :  { %v587_v27 = vpop.f32.mrf.mxu0  ;;  %v600_v28 = vpop.f32.mrf.mxu1 }
 0x320   :  { %v630_v30 = vadd.f32 %v587_v27, %v573_v20  ;;  %v631_v32 = vadd.f32 %v600_v28, %v574_v22 }
 0x322   :  { %v634_v36 = vmul.f32 0.5, %v630_v30  ;;  %v638_v37 = vmul.f32 0.5, %v631_v32 }
 0x324   :  { %1127 = vtanh.f32 %v634_v36 }
 0x325   :  { %1129 = vtanh.f32 %v638_v37 }
 0x326   :  { %v613_v49 = vpop.f32.mrf.mxu2  ;;  %v626_v51 = vpop.f32.mrf.mxu3 }
 0x327   :  { %v632_v52 = vadd.f32 %v613_v49, %v575_v39  ;;  %v633_v53 = vadd.f32 %v626_v51, %v576_v48  ;;  %v589_v55 = vpop.f32.mrf.mxu0  ;;  %v602_v59 = vpop.f32.mrf.mxu1  ;;  %v735_v39 = vld [vmem:[#allocation5 + $0x60] sm:$0xff] }
 0x328   :  { %v737_v48 = vunpack.c.l.bf16 %v735_v39  ;;  %v738_v49 = vunpack.c.h.bf16 %v735_v39  ;;  %v736_v59 = vld [vmem:[#allocation5 + $0x68] sm:$0xff] }
 0x329   :  { %1131 = vtanh.f32 %v632_v52  ;;  %v643_v60 = vmul.f32 0.5, %v633_v53 }
 0x32a   :  { %v1128_v61 = vpop.eup %1127 }
 0x32b   :  { %v1130_v63 = vpop.eup %1129  ;;  %v636_v0 = vmul.f32 0.5, %v1128_v61  ;;  %1133 = vtanh.f32 %v643_v60 }
 0x32c   :  { %v640_v1 = vmul.f32 0.5, %v1130_v63  ;;  %v739_v63 = vunpack.c.l.bf16 %v736_v59 }
 0x32d   :  { %v637_v2 = vadd.f32 0.5, %v636_v0  ;;  %v740_v0 = vunpack.c.h.bf16 %v736_v59 }
 0x32e   :  { %v641_v4 = vadd.f32 0.5, %v640_v1  ;;  %v615_v10 = vpop.f32.mrf.mxu2  ;;  %v628_v11 = vpop.f32.mrf.mxu3 }
 0x32f   :  { %v1132_v13 = vpop.eup %1131 }
 0x330   :  { %v647_v15 = vmul.f32 %v641_v4, %v1540_v54  ;;  %v648_v18 = vmul.f32 %v1132_v13, %v637_v2 }
 0x331   :  { %v1134_v19 = vpop.eup %1133 }
 0x332   :  { %v1576_v47 = vadd.f32 %v648_v18, %v647_v15  ;;  %v645_v20 = vmul.f32 0.5, %v1134_v19 }
 0x334   :  { %1135 = vtanh.f32 %v1576_v47  ;;  %v646_v22 = vadd.f32 0.5, %v645_v20 }
 0x33a   :  { %v1136_v27 = vpop.eup %1135 }
 0x33b   :  { %v651_v28 = vmul.f32 %v1136_v27, %v646_v22 }
 0x33d   :  { %v659_v30 = vpack.c.bf16 %v651_v28, %v651_v28 }
 0x33f   :  { %668 = vmatmul.bf16.vlgmr.msrb.gmra.mxu0 %v659_v30  ;;  %681 = vmatmul.bf16.vlgmr.msrb.gmra.mxu1 %v659_v30 }
 0x340   :  { %694 = vmatmul.bf16.vlgmr.msrb.gmra.mxu2 %v659_v30  ;;  %707 = vmatmul.bf16.vlgmr.msrb.gmra.mxu3 %v659_v30 }
 0x341   :  { %824 = vmatpush.bf16.msrb.mxu0 %v1272_v3  ;;  %837 = vmatpush.bf16.msrb.mxu1 %v1274_v7  ;;  %v653_v3 = vld [vmem:[#allocation5 + $0x50] sm:$0xff] }
 0x342   :  { %850 = vmatpush.bf16.msrb.mxu2 %v1276_v8  ;;  %863 = vmatpush.bf16.msrb.mxu3 %v1279_v12  ;;  %v655_v7 = vunpack.c.l.bf16 %v653_v3  ;;  %v656_v8 = vunpack.c.h.bf16 %v653_v3 }
 0x345   :  { %825 = vmatpush.bf16.msrb.mxu0 %v1283_v16  ;;  %838 = vmatpush.bf16.msrb.mxu1 %v1285_v17 }
 0x346   :  { %851 = vmatpush.bf16.msrb.mxu2 %v1288_v21  ;;  %864 = vmatpush.bf16.msrb.mxu3 %v1290_v25  ;;  %v654_v25 = vld [vmem:[#allocation5 + $0x58] sm:$0xff] }
 0x349   :  { %826 = vmatpush.bf16.msrb.mxu0 %v1293_v29  ;;  %839 = vmatpush.bf16.msrb.mxu1 %v1297_v33 }
 0x34a   :  { %852 = vmatpush.bf16.msrb.mxu2 %v1299_v34  ;;  %865 = vmatpush.bf16.msrb.mxu3 %v1302_v38  ;;  %v657_v34 = vunpack.c.l.bf16 %v654_v25  ;;  %v658_v38 = vunpack.c.h.bf16 %v654_v25 }
 0x34d   :  { %827 = vmatpush.bf16.msrb.mxu0 %v1305_v44  ;;  %840 = vmatpush.bf16.msrb.mxu1 %v1309_v45 }
 0x34e   :  { %853 = vmatpush.bf16.msrb.mxu2 %v1311_v46  ;;  %866 = vmatpush.bf16.msrb.mxu3 %v1314_v50 }
 0x351   :  { %828 = vmatpush.bf16.msrb.mxu0 %v1317_v56  ;;  %841 = vmatpush.bf16.msrb.mxu1 %v1321_v57 }
 0x352   :  { %854 = vmatpush.bf16.msrb.mxu2 %v1323_v58  ;;  %867 = vmatpush.bf16.msrb.mxu3 %v1326_v62 }
 0x355   :  { %829 = vmatpush.bf16.msrb.mxu0 %v1329_v5  ;;  %842 = vmatpush.bf16.msrb.mxu1 %v1333_v6 }
 0x356   :  { %855 = vmatpush.bf16.msrb.mxu2 %v1335_v9  ;;  %868 = vmatpush.bf16.msrb.mxu3 %v1338_v14 }
 0x359   :  { %830 = vmatpush.bf16.msrb.mxu0 %v1341_v23  ;;  %843 = vmatpush.bf16.msrb.mxu1 %v1345_v24 }
 0x35a   :  { %856 = vmatpush.bf16.msrb.mxu2 %v1347_v26  ;;  %869 = vmatpush.bf16.msrb.mxu3 %v1350_v31 }
 0x35d   :  { %831 = vmatpush.bf16.msrb.mxu0 %v1353_v40  ;;  %844 = vmatpush.bf16.msrb.mxu1 %v1357_v41 }
 0x35e   :  { %857 = vmatpush.bf16.msrb.mxu2 %v1359_v42  ;;  %870 = vmatpush.bf16.msrb.mxu3 %v1362_v43 }
 0x3bc   :  { %v669_v12 = vpop.f32.mrf.mxu0  ;;  %v682_v16 = vpop.f32.mrf.mxu1 }
 0x3bd   :  { %v712_v17 = vadd.f32 %v669_v12, %v655_v7  ;;  %v713_v21 = vadd.f32 %v682_v16, %v656_v8 }
 0x3bf   :  { %v716_v29 = vmul.f32 0.5, %v712_v17  ;;  %v720_v33 = vmul.f32 0.5, %v713_v21 }
 0x3c1   :  { %1137 = vtanh.f32 %v716_v29 }
 0x3c2   :  { %1139 = vtanh.f32 %v720_v33 }
 0x3c3   :  { %v695_v44 = vpop.f32.mrf.mxu2  ;;  %v708_v45 = vpop.f32.mrf.mxu3 }
 0x3c4   :  { %v714_v46 = vadd.f32 %v695_v44, %v657_v34  ;;  %v715_v50 = vadd.f32 %v708_v45, %v658_v38  ;;  %v671_v56 = vpop.f32.mrf.mxu0  ;;  %v684_v57 = vpop.f32.mrf.mxu1  ;;  %v817_v34 = vld [vmem:[#allocation5 + $0x70] sm:$0xff] }
 0x3c5   :  { %v819_v38 = vunpack.c.l.bf16 %v817_v34  ;;  %v820_v44 = vunpack.c.h.bf16 %v817_v34  ;;  %v818_v57 = vld [vmem:[#allocation5 + $0x78] sm:$0xff] }
 0x3c6   :  { %1141 = vtanh.f32 %v714_v46  ;;  %v725_v58 = vmul.f32 0.5, %v715_v50 }
 0x3c7   :  { %v1138_v62 = vpop.eup %1137 }
 0x3c8   :  { %v1140_v5 = vpop.eup %1139  ;;  %v718_v6 = vmul.f32 0.5, %v1138_v62  ;;  %1143 = vtanh.f32 %v725_v58 }
 0x3c9   :  { %v722_v9 = vmul.f32 0.5, %v1140_v5  ;;  %v821_v5 = vunpack.c.l.bf16 %v818_v57 }
 0x3ca   :  { %v719_v14 = vadd.f32 0.5, %v718_v6  ;;  %v822_v6 = vunpack.c.h.bf16 %v818_v57 }
 0x3cb   :  { %v723_v23 = vadd.f32 0.5, %v722_v9  ;;  %v697_v24 = vpop.f32.mrf.mxu2  ;;  %v710_v26 = vpop.f32.mrf.mxu3 }
 0x3cc   :  { %v1142_v31 = vpop.eup %1141 }
 0x3cd   :  { %v729_v40 = vmul.f32 %v723_v23, %v1576_v47  ;;  %v730_v41 = vmul.f32 %v1142_v31, %v719_v14 }
 0x3ce   :  { %v1144_v42 = vpop.eup %1143 }
 0x3cf   :  { %v731_v43 = vadd.f32 %v730_v41, %v729_v40  ;;  %v727_v54 = vmul.f32 0.5, %v1144_v42 }
 0x3d1   :  { %1145 = vtanh.f32 %v731_v43  ;;  %v728_v32 = vadd.f32 0.5, %v727_v54 }
 0x3d7   :  { %v1146_v35 = vpop.eup %1145 }
 0x3d8   :  { %v733_v36 = vmul.f32 %v1146_v35, %v728_v32 }
 0x3da   :  { %v741_v37 = vpack.c.bf16 %v733_v36, %v733_v36 }
 0x3dc   :  { %750 = vmatmul.bf16.vlgmr.msra.gmra.mxu0 %v741_v37  ;;  %763 = vmatmul.bf16.vlgmr.msra.gmra.mxu1 %v741_v37 }
 0x3dd   :  { %776 = vmatmul.bf16.vlgmr.msra.gmra.mxu2 %v741_v37  ;;  %789 = vmatmul.bf16.vlgmr.msra.gmra.mxu3 %v741_v37 }
 0x459   :  { %v751_v51 = vpop.f32.mrf.mxu0  ;;  %v764_v52 = vpop.f32.mrf.mxu1 }
 0x45a   :  { %v794_v53 = vadd.f32 %v751_v51, %v737_v48  ;;  %v795_v55 = vadd.f32 %v764_v52, %v738_v49 }
 0x45c   :  { %v798_v60 = vmul.f32 0.5, %v794_v53  ;;  %v802_v61 = vmul.f32 0.5, %v795_v55 }
 0x45e   :  { %1147 = vtanh.f32 %v798_v60 }
 0x45f   :  { %1149 = vtanh.f32 %v802_v61 }
 0x460   :  { %v777_v1 = vpop.f32.mrf.mxu2  ;;  %v790_v2 = vpop.f32.mrf.mxu3 }
 0x461   :  { %v796_v4 = vadd.f32 %v777_v1, %v739_v63  ;;  %v797_v10 = vadd.f32 %v790_v2, %v740_v0  ;;  %v753_v11 = vpop.f32.mrf.mxu0  ;;  %v766_v13 = vpop.f32.mrf.mxu1 }
 0x463   :  { %1151 = vtanh.f32 %v796_v4  ;;  %v807_v15 = vmul.f32 0.5, %v797_v10 }
 0x464   :  { %v1148_v18 = vpop.eup %1147 }
 0x465   :  { %v1150_v19 = vpop.eup %1149  ;;  %v800_v47 = vmul.f32 0.5, %v1148_v18  ;;  %1153 = vtanh.f32 %v807_v15 }
 0x466   :  { %v804_v20 = vmul.f32 0.5, %v1150_v19 }
 0x467   :  { %v801_v22 = vadd.f32 0.5, %v800_v47 }
 0x468   :  { %v805_v27 = vadd.f32 0.5, %v804_v20  ;;  %v779_v28 = vpop.f32.mrf.mxu2  ;;  %v792_v30 = vpop.f32.mrf.mxu3 }
 0x469   :  { %v1152_v3 = vpop.eup %1151 }
 0x46a   :  { %v811_v7 = vmul.f32 %v805_v27, %v731_v43  ;;  %v812_v8 = vmul.f32 %v1152_v3, %v801_v22 }
 0x46b   :  { %v1154_v12 = vpop.eup %1153 }
 0x46c   :  { %v813_v16 = vadd.f32 %v812_v8, %v811_v7  ;;  %v809_v17 = vmul.f32 0.5, %v1154_v12 }
 0x46e   :  { %1155 = vtanh.f32 %v813_v16  ;;  %v810_v21 = vadd.f32 0.5, %v809_v17 }
 0x474   :  { %v1156_v25 = vpop.eup %1155 }
 0x475   :  { %v815_v29 = vmul.f32 %v1156_v25, %v810_v21 }
 0x477   :  { %v823_v33 = vpack.c.bf16 %v815_v29, %v815_v29 }
 0x479   :  { %832 = vmatmul.bf16.vlgmr.msrb.gmra.mxu0 %v823_v33  ;;  %845 = vmatmul.bf16.vlgmr.msrb.gmra.mxu1 %v823_v33 }
 0x47a   :  { %858 = vmatmul.bf16.vlgmr.msrb.gmra.mxu2 %v823_v33  ;;  %871 = vmatmul.bf16.vlgmr.msrb.gmra.mxu3 %v823_v33 }
 0x4f6   :  { %v833_v45 = vpop.f32.mrf.mxu0  ;;  %v846_v46 = vpop.f32.mrf.mxu1 }
 0x4f7   :  { %v876_v50 = vadd.f32 %v833_v45, %v819_v38  ;;  %v877_v56 = vadd.f32 %v846_v46, %v820_v44 }
 0x4f9   :  { %v880_v58 = vmul.f32 0.5, %v876_v50  ;;  %v884_v62 = vmul.f32 0.5, %v877_v56 }
 0x4fb   :  { %1157 = vtanh.f32 %v880_v58 }
 0x4fc   :  { %1159 = vtanh.f32 %v884_v62 }
 0x4fd   :  { %v859_v9 = vpop.f32.mrf.mxu2  ;;  %v872_v14 = vpop.f32.mrf.mxu3 }
 0x4fe   :  { %v878_v23 = vadd.f32 %v859_v9, %v821_v5  ;;  %v879_v24 = vadd.f32 %v872_v14, %v822_v6  ;;  %v835_v26 = vpop.f32.mrf.mxu0  ;;  %v848_v31 = vpop.f32.mrf.mxu1 }
 0x500   :  { %1161 = vtanh.f32 %v878_v23  ;;  %v889_v40 = vmul.f32 0.5, %v879_v24 }
 0x501   :  { %v1158_v41 = vpop.eup %1157 }
 0x502   :  { %v1160_v42 = vpop.eup %1159  ;;  %v882_v43 = vmul.f32 0.5, %v1158_v41  ;;  %1163 = vtanh.f32 %v889_v40 }
 0x503   :  { %v886_v54 = vmul.f32 0.5, %v1160_v42 }
 0x504   :  { %v883_v32 = vadd.f32 0.5, %v882_v43 }
 0x505   :  { %v887_v35 = vadd.f32 0.5, %v886_v54  ;;  %v861_v36 = vpop.f32.mrf.mxu2  ;;  %v874_v37 = vpop.f32.mrf.mxu3 }
 0x506   :  { %v1162_v39 = vpop.eup %1161 }
 0x507   :  { %v893_v48 = vmul.f32 %v887_v35, %v813_v16  ;;  %v894_v49 = vmul.f32 %v1162_v39, %v883_v32 }
 0x508   :  { %v1164_v51 = vpop.eup %1163 }
 0x509   :  { %v895_v52 = vadd.f32 %v894_v49, %v893_v48  ;;  %v891_v53 = vmul.f32 0.5, %v1164_v51 }
 0x50b   :  { %1165 = vtanh.f32 %v895_v52  ;;  %v892_v55 = vadd.f32 0.5, %v891_v53 }
 0x511   :  { %v1166_v59 = vpop.eup %1165 }
 0x512   :  { %v897_v60 = vmul.f32 %v1166_v59, %v892_v55 }
 0x514   :  { %903 = vst [vmem:[#allocation8] sm:$0xff] %v897_v60 }
 0x515   :  { %914 = dma.vmem_to_hbm [thread:$0]  %s910_s1, 128, %s912_s23, [#allocation7]  }
 0x516   :  { %1243 = dma.done.wait [#allocation7], 128  }
 0x517   :  { %1244 = vsyncadd [#allocation7], 4294967168 }
 0x518   :  { %919 = vsyncpa [#allocation6], 1 }
 0x519   :  { %920 = vsyncpa [#allocation7], 1 }

</bundles_post_ra>
